<compile_context>
chip_gen: v7x
topology: tpu7x:2x2x1
jax: 0.10.0
libtpu: 0.0.40
codegen_flags: <defaults>
</compile_context>

<pallas_src>
import jax
import jax.numpy as jnp
from jax import lax
from jax.experimental import pallas as pl
from jax.experimental.pallas import tpu as pltpu


def _round_up(n, m):
    return ((n + m - 1) // m) * m


def _lstm_kernel(x_ref, wih_ref, whh_ref, b_ref, h0_ref, c0_ref,
                 hseq_ref, cT_ref, pre_ref):
    """Refs:
      x_ref   : (T*B_pad, I)     bf16   time-major, rows grouped by timestep
      wih_ref : (I, 4*Hp)        bf16   per-gate column blocks padded to Hp
      whh_ref : (Hp, 4*Hp)       bf16   rows [H:Hp) are zero
      b_ref   : (1, 4*Hp)        f32    b_ih + b_hh, per-gate padded
      h0_ref  : (B_pad, Hp)      f32
      c0_ref  : (B_pad, Hp)      f32
      hseq_ref: (T, B_pad, Hp)   f32    output: h_t for every step (lane-dense)
      cT_ref  : (B_pad, Hp)      f32    output: final cell state
      pre_ref : (T*B_pad, 4*Hp)  f32    scratch: precomputed input projection
    """
    T, B_pad, Hp = hseq_ref.shape

    # ---- hoisted input projection: one matmul for all timesteps (+ bias) ----
    # Removes T tiny matmuls and the per-step bias broadcast from the serial
    # recurrence critical path.
    pre_ref[...] = (
        jnp.dot(x_ref[...], wih_ref[...], preferred_element_type=jnp.float32)
        + b_ref[...])

    whh = whh_ref[...]                                   # (Hp, 4*Hp) bf16

    def step(t, carry):
        h, c = carry                                     # (B_pad, Hp) f32
        row = pl.multiple_of(t * B_pad, B_pad)           # aligned sublane offset
        gates = pre_ref[pl.ds(row, B_pad), :] + jnp.dot(
            h.astype(whh.dtype), whh, preferred_element_type=jnp.float32)
        # Per-gate blocks are full 128-lane-aligned vregs -> free slices.
        i_g = jax.nn.sigmoid(gates[:, 0 * Hp:1 * Hp])
        f_g = jax.nn.sigmoid(gates[:, 1 * Hp:2 * Hp])
        g_g = jnp.tanh(gates[:, 2 * Hp:3 * Hp])
        o_g = jax.nn.sigmoid(gates[:, 3 * Hp:4 * Hp])
        c_new = f_g * c + i_g * g_g                      # padding lanes stay 0
        h_new = o_g * jnp.tanh(c_new)
        hseq_ref[t] = h_new                              # unmasked (8,128) store
        return (h_new, c_new)

    # Fully unrolled (T is static & small) for cross-timestep scheduling.
    _, c_fin = lax.fori_loop(0, T, step, (h0_ref[...], c0_ref[...]),
                             unroll=True)
    cT_ref[...] = c_fin.astype(cT_ref.dtype)
    # final h is hseq_ref[T-1]; no separate output needed.


def my_lstm_forward(x, params, h0, c0):
    """x: (B, T, I). Returns (y, (h_n, c_n)) matching the torch module:
       y = relu(Linear(LSTM(x)_outputs)), shape (B, T, 1); h_n, c_n: (1, B, H).
    """
    B, T, I = x.shape
    H = params["w_hh"].shape[1]                          # torch w_hh: (4H, H)
    Hp = _round_up(H, 128)                               # per-gate lane width
    B_pad = _round_up(B, 8)                              # sublane-dense batch

    f32 = jnp.float32
    mxu_dtype = jnp.bfloat16                             # MXU inputs; f32 accum

    w_ih = params["w_ih"].astype(f32)                    # (4H, I)
    w_hh = params["w_hh"].astype(f32)                    # (4H, H)
    bias = (params["b_ih"] + params["b_hh"]).astype(f32) # (4H,)

    def widen_gates(m):
        # (R, 4H) -> (R, 4*Hp): pad each gate's H columns to Hp with zeros.
        chunks = jnp.split(m, 4, axis=1)
        chunks = [jnp.pad(ck, ((0, 0), (0, Hp - H))) for ck in chunks]
        return jnp.concatenate(chunks, axis=1)

    w_ih_wide = widen_gates(w_ih.T).astype(mxu_dtype)    # (I, 4*Hp)
    w_hh_wide = jnp.pad(widen_gates(w_hh.T),
                        ((0, Hp - H), (0, 0))).astype(mxu_dtype)  # (Hp, 4*Hp)
    b_wide = widen_gates(bias.reshape(1, 4 * H))         # (1, 4*Hp) f32

    # x: (B, T, I) -> pad batch -> time-major -> (T*B_pad, I), bf16.
    x_p = jnp.pad(x.astype(f32), ((0, B_pad - B), (0, 0), (0, 0)))
    x2d = jnp.transpose(x_p, (1, 0, 2)).reshape(T * B_pad, I).astype(mxu_dtype)

    h0_p = jnp.pad(h0.reshape(B, H).astype(f32),
                   ((0, B_pad - B), (0, Hp - H)))        # (B_pad, Hp)
    c0_p = jnp.pad(c0.reshape(B, H).astype(f32),
                   ((0, B_pad - B), (0, Hp - H)))        # (B_pad, Hp)

    vmem = pl.BlockSpec(memory_space=pltpu.MemorySpace.VMEM)

    hseq, c_fin = pl.pallas_call(
        _lstm_kernel,
        out_shape=(
            jax.ShapeDtypeStruct((T, B_pad, Hp), f32),   # h_t for all steps
            jax.ShapeDtypeStruct((B_pad, Hp), f32),      # final c
        ),
        in_specs=[vmem] * 6,
        out_specs=(vmem, vmem),
        scratch_shapes=[pltpu.VMEM((T * B_pad, 4 * Hp), f32)],
    )(x2d, w_ih_wide, w_hh_wide, b_wide, h0_p, c0_p)

    # ---- hoisted output head (Linear(H,1) + ReLU) as ONE batched matmul ----
    h_seq = hseq[:, :B, :H]                              # (T, B, H) f32
    w_out = params["w_out"].astype(f32)                  # (1, H)
    b_out = params["b_out"].astype(f32)                  # (1,)
    y_tm = jnp.maximum(jnp.einsum("tbh,oh->tbo", h_seq, w_out) + b_out, 0.0)
    y = jnp.transpose(y_tm, (1, 0, 2))                   # (B, T, 1)

    h_n = hseq[T - 1, :B, :H].reshape(1, B, H)
    c_n = c_fin[:B, :H].reshape(1, B, H)
    return y, (h_n, c_n)


# ----------------------------- reference & init -----------------------------

def _reference_forward(x, params, h0, c0):
    """Pure-JAX f32 reference of the torch forward (for correctness check)."""
    B, T, _ = x.shape
    H = h0.shape[-1]
    w_ih = params["w_ih"].astype(jnp.float32)
    w_hh = params["w_hh"].astype(jnp.float32)
    b = (params["b_ih"] + params["b_hh"]).astype(jnp.float32)
    h = h0.reshape(B, H).astype(jnp.float32)
    c = c0.reshape(B, H).astype(jnp.float32)
    hs = []
    for t in range(T):
        g = x[:, t, :].astype(jnp.float32) @ w_ih.T + h @ w_hh.T + b
        i_g = jax.nn.sigmoid(g[:, 0 * H:1 * H])
        f_g = jax.nn.sigmoid(g[:, 1 * H:2 * H])
        g_g = jnp.tanh(g[:, 2 * H:3 * H])
        o_g = jax.nn.sigmoid(g[:, 3 * H:4 * H])
        c = f_g * c + i_g * g_g
        h = o_g * jnp.tanh(c)
        hs.append(h)
    hseq = jnp.stack(hs, axis=1)                         # (B, T, H)
    y = jnp.maximum(hseq @ params["w_out"].astype(jnp.float32).T
                    + params["b_out"].astype(jnp.float32), 0.0)
    return y, (h.reshape(1, B, H), c.reshape(1, B, H))


def _xavier_normal(key, shape):
    fan_out, fan_in = shape[0], shape[1]
    if len(shape) > 2:
        rf = 1
        for s in shape[2:]:
            rf *= s
        fan_in *= rf
        fan_out *= rf
    std = (2.0 / (fan_in + fan_out)) ** 0.5
    return std * jax.random.normal(key, shape, dtype=jnp.float32)


def init_params(key, input_size, hidden_size):
    k = jax.random.split(key, 6)
    bound = 1.0 / (hidden_size ** 0.5)  # torch default LSTM/Linear init range
    u = lambda kk, shape: jax.random.uniform(
        kk, shape, dtype=jnp.float32, minval=-bound, maxval=bound)
    return {
        "w_ih": u(k[0], (4 * hidden_size, input_size)),
        "w_hh": u(k[1], (4 * hidden_size, hidden_size)),
        "b_ih": u(k[2], (4 * hidden_size,)),
        "b_hh": u(k[3], (4 * hidden_size,)),
        "w_out": u(k[4], (1, hidden_size)),
        "b_out": u(k[5], (1,)),
    }


if __name__ == "__main__":
    input_size = 16
    hidden_size = 32
    batch_size = 2
    seq_len = 8

    root = jax.random.PRNGKey(0)
    k_param, k_h0, k_c0, k_x = jax.random.split(root, 4)

    params = init_params(k_param, input_size, hidden_size)
    # self.hidden = init_hidden(): xavier_normal_ on (1, B, H) tensors
    h0 = _xavier_normal(k_h0, (1, batch_size, hidden_size))
    c0 = _xavier_normal(k_c0, (1, batch_size, hidden_size))
    x = jax.random.normal(k_x, (batch_size, seq_len, input_size),
                          dtype=jnp.float32)

    fwd = jax.jit(my_lstm_forward)
    y, (h_n, c_n) = fwd(x, params, h0, c0)
    jax.block_until_ready((y, h_n, c_n))

    assert y.shape == (batch_size, seq_len, 1)
    assert h_n.shape == (1, batch_size, hidden_size)
    assert c_n.shape == (1, batch_size, hidden_size)

    # Correctness vs pure-JAX f32 reference (bf16 MXU inputs -> loose tol).
    y_ref, (h_ref, c_ref) = _reference_forward(x, params, h0, c0)
    assert jnp.allclose(y, y_ref, rtol=5e-2, atol=3e-2)
    assert jnp.allclose(h_n, h_ref, rtol=5e-2, atol=3e-2)
    assert jnp.allclose(c_n, c_ref, rtol=5e-2, atol=3e-2)

    print("KERNEL_OK")
</pallas_src>

<mosaic_0001>
module attributes {stable_mosaic.version = 11 : i64} {
  func.func @_lstm_kernel(%arg0: memref<64x16xbf16, #tpu.memory_space<vmem>>, %arg1: memref<16x512xbf16, #tpu.memory_space<vmem>>, %arg2: memref<128x512xbf16, #tpu.memory_space<vmem>>, %arg3: memref<1x512xf32, #tpu.memory_space<vmem>>, %arg4: memref<8x128xf32, #tpu.memory_space<vmem>>, %arg5: memref<8x128xf32, #tpu.memory_space<vmem>>, %arg6: memref<8x8x128xf32, #tpu.memory_space<vmem>>, %arg7: memref<8x128xf32, #tpu.memory_space<vmem>>, %arg8: memref<64x512xf32, #tpu.memory_space<vmem>>) attributes {dimension_semantics = [], scalar_prefetch = 0 : i64, scratch_operands = 1 : i64, tpu.core_type = #tpu.core_type<tc>} {
    %c0 = arith.constant 0 : index
    %c0_0 = arith.constant 0 : index
    %0 = vector.load %arg0[%c0, %c0_0] : memref<64x16xbf16, #tpu.memory_space<vmem>>, vector<64x16xbf16>
    %c0_1 = arith.constant 0 : index
    %c0_2 = arith.constant 0 : index
    %1 = vector.load %arg1[%c0_1, %c0_2] : memref<16x512xbf16, #tpu.memory_space<vmem>>, vector<16x512xbf16>
    %cst = arith.constant dense<0.000000e+00> : vector<64x512xf32>
    %2 = tpu.matmul %0, %1, %cst {dimension_numbers = #tpu.dot_dimension_numbers<[1], [0], [0], [1], [0, 0, 1, 1], [], []>} : vector<64x16xbf16>, vector<16x512xbf16>, vector<64x512xf32> -> vector<64x512xf32>
    %c0_3 = arith.constant 0 : index
    %c0_4 = arith.constant 0 : index
    %3 = vector.load %arg3[%c0_3, %c0_4] : memref<1x512xf32, #tpu.memory_space<vmem>>, vector<1x512xf32>
    %4 = vector.broadcast %3 : vector<1x512xf32> to vector<64x512xf32>
    %5 = arith.addf %2, %4 : vector<64x512xf32>
    %c0_5 = arith.constant 0 : index
    %c0_6 = arith.constant 0 : index
    %6 = vector.load %arg8[%c0_5, %c0_6] : memref<64x512xf32, #tpu.memory_space<vmem>>, vector<64x512xf32>
    tpu.vector_store %arg8[%c0_5, %c0_6], %5 {strides = array<i32>} : memref<64x512xf32, #tpu.memory_space<vmem>>, vector<64x512xf32>,
    %c0_7 = arith.constant 0 : index
    %c0_8 = arith.constant 0 : index
    %7 = vector.load %arg2[%c0_7, %c0_8] : memref<128x512xbf16, #tpu.memory_space<vmem>>, vector<128x512xbf16>
    %c0_9 = arith.constant 0 : index
    %c0_10 = arith.constant 0 : index
    %8 = vector.load %arg4[%c0_9, %c0_10] : memref<8x128xf32, #tpu.memory_space<vmem>>, vector<8x128xf32>
    %c0_11 = arith.constant 0 : index
    %c0_12 = arith.constant 0 : index
    %9 = vector.load %arg5[%c0_11, %c0_12] : memref<8x128xf32, #tpu.memory_space<vmem>>, vector<8x128xf32>
    %c0_i32 = arith.constant 0 : i32
    %c8_i32 = arith.constant 8 : i32
    %10 = arith.muli %c0_i32, %c8_i32 : i32
    %11 = tpu.assume_multiple %10, 8 : i32
    %12 = arith.index_cast %11 : i32 to index
    %c0_13 = arith.constant 0 : index
    %13 = vector.load %arg8[%12, %c0_13] : memref<64x512xf32, #tpu.memory_space<vmem>>, vector<8x512xf32>
    %14 = arith.truncf %8 : vector<8x128xf32> to vector<8x128xbf16>
    %cst_14 = arith.constant dense<0.000000e+00> : vector<8x512xf32>
    %15 = tpu.matmul %14, %7, %cst_14 {dimension_numbers = #tpu.dot_dimension_numbers<[1], [0], [0], [1], [0, 0, 1, 1], [], []>} : vector<8x128xbf16>, vector<128x512xbf16>, vector<8x512xf32> -> vector<8x512xf32>
    %16 = arith.addf %13, %15 : vector<8x512xf32>
    %17 = vector.extract_strided_slice %16 {offsets = [0, 0], sizes = [8, 128], strides = [1, 1]} : vector<8x512xf32> to vector<8x128xf32>
    %18 = arith.negf %17 : vector<8x128xf32>
    %19 = math.exp %18 : vector<8x128xf32>
    %cst_15 = arith.constant 1.000000e+00 : f32
    %20 = vector.broadcast %cst_15 : f32 to vector<8x128xf32>
    %21 = arith.addf %20, %19 : vector<8x128xf32>
    %22 = arith.divf %20, %21 : vector<8x128xf32>
    %23 = vector.extract_strided_slice %16 {offsets = [0, 128], sizes = [8, 128], strides = [1, 1]} : vector<8x512xf32> to vector<8x128xf32>
    %24 = arith.negf %23 : vector<8x128xf32>
    %25 = math.exp %24 : vector<8x128xf32>
    %cst_16 = arith.constant 1.000000e+00 : f32
    %26 = vector.broadcast %cst_16 : f32 to vector<8x128xf32>
    %27 = arith.addf %26, %25 : vector<8x128xf32>
    %28 = arith.divf %26, %27 : vector<8x128xf32>
    %29 = vector.extract_strided_slice %16 {offsets = [0, 256], sizes = [8, 128], strides = [1, 1]} : vector<8x512xf32> to vector<8x128xf32>
    %30 = math.tanh %29 : vector<8x128xf32>
    %31 = vector.extract_strided_slice %16 {offsets = [0, 384], sizes = [8, 128], strides = [1, 1]} : vector<8x512xf32> to vector<8x128xf32>
    %32 = arith.negf %31 : vector<8x128xf32>
    %33 = math.exp %32 : vector<8x128xf32>
    %cst_17 = arith.constant 1.000000e+00 : f32
    %34 = vector.broadcast %cst_17 : f32 to vector<8x128xf32>
    %35 = arith.addf %34, %33 : vector<8x128xf32>
    %36 = arith.divf %34, %35 : vector<8x128xf32>
    %37 = arith.mulf %28, %9 : vector<8x128xf32>
    %38 = arith.mulf %22, %30 : vector<8x128xf32>
    %39 = arith.addf %37, %38 : vector<8x128xf32>
    %40 = math.tanh %39 : vector<8x128xf32>
    %41 = arith.mulf %36, %40 : vector<8x128xf32>
    %42 = arith.index_cast %c0_i32 : i32 to index
    %c0_18 = arith.constant 0 : index
    %c0_19 = arith.constant 0 : index
    %43 = vector.load %arg6[%42, %c0_18, %c0_19] : memref<8x8x128xf32, #tpu.memory_space<vmem>>, vector<1x8x128xf32>
    %44 = vector.shape_cast %43 : vector<1x8x128xf32> to vector<8x128xf32>
    %45 = vector.shape_cast %41 : vector<8x128xf32> to vector<1x8x128xf32>
    tpu.vector_store %arg6[%42, %c0_18, %c0_19], %45 {strides = array<i32>} : memref<8x8x128xf32, #tpu.memory_space<vmem>>, vector<1x8x128xf32>,
    %c1_i32 = arith.constant 1 : i32
    %c8_i32_20 = arith.constant 8 : i32
    %46 = arith.muli %c1_i32, %c8_i32_20 : i32
    %47 = tpu.assume_multiple %46, 8 : i32
    %48 = arith.index_cast %47 : i32 to index
    %c0_21 = arith.constant 0 : index
    %49 = vector.load %arg8[%48, %c0_21] : memref<64x512xf32, #tpu.memory_space<vmem>>, vector<8x512xf32>
    %50 = arith.truncf %41 : vector<8x128xf32> to vector<8x128xbf16>
    %cst_22 = arith.constant dense<0.000000e+00> : vector<8x512xf32>
    %51 = tpu.matmul %50, %7, %cst_22 {dimension_numbers = #tpu.dot_dimension_numbers<[1], [0], [0], [1], [0, 0, 1, 1], [], []>} : vector<8x128xbf16>, vector<128x512xbf16>, vector<8x512xf32> -> vector<8x512xf32>
    %52 = arith.addf %49, %51 : vector<8x512xf32>
    %53 = vector.extract_strided_slice %52 {offsets = [0, 0], sizes = [8, 128], strides = [1, 1]} : vector<8x512xf32> to vector<8x128xf32>
    %54 = arith.negf %53 : vector<8x128xf32>
    %55 = math.exp %54 : vector<8x128xf32>
    %cst_23 = arith.constant 1.000000e+00 : f32
    %56 = vector.broadcast %cst_23 : f32 to vector<8x128xf32>
    %57 = arith.addf %56, %55 : vector<8x128xf32>
    %58 = arith.divf %56, %57 : vector<8x128xf32>
    %59 = vector.extract_strided_slice %52 {offsets = [0, 128], sizes = [8, 128], strides = [1, 1]} : vector<8x512xf32> to vector<8x128xf32>
    %60 = arith.negf %59 : vector<8x128xf32>
    %61 = math.exp %60 : vector<8x128xf32>
    %cst_24 = arith.constant 1.000000e+00 : f32
    %62 = vector.broadcast %cst_24 : f32 to vector<8x128xf32>
    %63 = arith.addf %62, %61 : vector<8x128xf32>
    %64 = arith.divf %62, %63 : vector<8x128xf32>
    %65 = vector.extract_strided_slice %52 {offsets = [0, 256], sizes = [8, 128], strides = [1, 1]} : vector<8x512xf32> to vector<8x128xf32>
    %66 = math.tanh %65 : vector<8x128xf32>
    %67 = vector.extract_strided_slice %52 {offsets = [0, 384], sizes = [8, 128], strides = [1, 1]} : vector<8x512xf32> to vector<8x128xf32>
    %68 = arith.negf %67 : vector<8x128xf32>
    %69 = math.exp %68 : vector<8x128xf32>
    %cst_25 = arith.constant 1.000000e+00 : f32
    %70 = vector.broadcast %cst_25 : f32 to vector<8x128xf32>
    %71 = arith.addf %70, %69 : vector<8x128xf32>
    %72 = arith.divf %70, %71 : vector<8x128xf32>
    %73 = arith.mulf %64, %39 : vector<8x128xf32>
    %74 = arith.mulf %58, %66 : vector<8x128xf32>
    %75 = arith.addf %73, %74 : vector<8x128xf32>
    %76 = math.tanh %75 : vector<8x128xf32>
    %77 = arith.mulf %72, %76 : vector<8x128xf32>
    %78 = arith.index_cast %c1_i32 : i32 to index
    %c0_26 = arith.constant 0 : index
    %c0_27 = arith.constant 0 : index
    %79 = vector.load %arg6[%78, %c0_26, %c0_27] : memref<8x8x128xf32, #tpu.memory_space<vmem>>, vector<1x8x128xf32>
    %80 = vector.shape_cast %79 : vector<1x8x128xf32> to vector<8x128xf32>
    %81 = vector.shape_cast %77 : vector<8x128xf32> to vector<1x8x128xf32>
    tpu.vector_store %arg6[%78, %c0_26, %c0_27], %81 {strides = array<i32>} : memref<8x8x128xf32, #tpu.memory_space<vmem>>, vector<1x8x128xf32>,
    %c2_i32 = arith.constant 2 : i32
    %c8_i32_28 = arith.constant 8 : i32
    %82 = arith.muli %c2_i32, %c8_i32_28 : i32
    %83 = tpu.assume_multiple %82, 8 : i32
    %84 = arith.index_cast %83 : i32 to index
    %c0_29 = arith.constant 0 : index
    %85 = vector.load %arg8[%84, %c0_29] : memref<64x512xf32, #tpu.memory_space<vmem>>, vector<8x512xf32>
    %86 = arith.truncf %77 : vector<8x128xf32> to vector<8x128xbf16>
    %cst_30 = arith.constant dense<0.000000e+00> : vector<8x512xf32>
    %87 = tpu.matmul %86, %7, %cst_30 {dimension_numbers = #tpu.dot_dimension_numbers<[1], [0], [0], [1], [0, 0, 1, 1], [], []>} : vector<8x128xbf16>, vector<128x512xbf16>, vector<8x512xf32> -> vector<8x512xf32>
    %88 = arith.addf %85, %87 : vector<8x512xf32>
    %89 = vector.extract_strided_slice %88 {offsets = [0, 0], sizes = [8, 128], strides = [1, 1]} : vector<8x512xf32> to vector<8x128xf32>
    %90 = arith.negf %89 : vector<8x128xf32>
    %91 = math.exp %90 : vector<8x128xf32>
    %cst_31 = arith.constant 1.000000e+00 : f32
    %92 = vector.broadcast %cst_31 : f32 to vector<8x128xf32>
    %93 = arith.addf %92, %91 : vector<8x128xf32>
    %94 = arith.divf %92, %93 : vector<8x128xf32>
    %95 = vector.extract_strided_slice %88 {offsets = [0, 128], sizes = [8, 128], strides = [1, 1]} : vector<8x512xf32> to vector<8x128xf32>
    %96 = arith.negf %95 : vector<8x128xf32>
    %97 = math.exp %96 : vector<8x128xf32>
    %cst_32 = arith.constant 1.000000e+00 : f32
    %98 = vector.broadcast %cst_32 : f32 to vector<8x128xf32>
    %99 = arith.addf %98, %97 : vector<8x128xf32>
    %100 = arith.divf %98, %99 : vector<8x128xf32>
    %101 = vector.extract_strided_slice %88 {offsets = [0, 256], sizes = [8, 128], strides = [1, 1]} : vector<8x512xf32> to vector<8x128xf32>
    %102 = math.tanh %101 : vector<8x128xf32>
    %103 = vector.extract_strided_slice %88 {offsets = [0, 384], sizes = [8, 128], strides = [1, 1]} : vector<8x512xf32> to vector<8x128xf32>
    %104 = arith.negf %103 : vector<8x128xf32>
    %105 = math.exp %104 : vector<8x128xf32>
    %cst_33 = arith.constant 1.000000e+00 : f32
    %106 = vector.broadcast %cst_33 : f32 to vector<8x128xf32>
    %107 = arith.addf %106, %105 : vector<8x128xf32>
    %108 = arith.divf %106, %107 : vector<8x128xf32>
    %109 = arith.mulf %100, %75 : vector<8x128xf32>
    %110 = arith.mulf %94, %102 : vector<8x128xf32>
    %111 = arith.addf %109, %110 : vector<8x128xf32>
    %112 = math.tanh %111 : vector<8x128xf32>
    %113 = arith.mulf %108, %112 : vector<8x128xf32>
    %114 = arith.index_cast %c2_i32 : i32 to index
    %c0_34 = arith.constant 0 : index
    %c0_35 = arith.constant 0 : index
    %115 = vector.load %arg6[%114, %c0_34, %c0_35] : memref<8x8x128xf32, #tpu.memory_space<vmem>>, vector<1x8x128xf32>
    %116 = vector.shape_cast %115 : vector<1x8x128xf32> to vector<8x128xf32>
    %117 = vector.shape_cast %113 : vector<8x128xf32> to vector<1x8x128xf32>
    tpu.vector_store %arg6[%114, %c0_34, %c0_35], %117 {strides = array<i32>} : memref<8x8x128xf32, #tpu.memory_space<vmem>>, vector<1x8x128xf32>,
    %c3_i32 = arith.constant 3 : i32
    %c8_i32_36 = arith.constant 8 : i32
    %118 = arith.muli %c3_i32, %c8_i32_36 : i32
    %119 = tpu.assume_multiple %118, 8 : i32
    %120 = arith.index_cast %119 : i32 to index
    %c0_37 = arith.constant 0 : index
    %121 = vector.load %arg8[%120, %c0_37] : memref<64x512xf32, #tpu.memory_space<vmem>>, vector<8x512xf32>
    %122 = arith.truncf %113 : vector<8x128xf32> to vector<8x128xbf16>
    %cst_38 = arith.constant dense<0.000000e+00> : vector<8x512xf32>
    %123 = tpu.matmul %122, %7, %cst_38 {dimension_numbers = #tpu.dot_dimension_numbers<[1], [0], [0], [1], [0, 0, 1, 1], [], []>} : vector<8x128xbf16>, vector<128x512xbf16>, vector<8x512xf32> -> vector<8x512xf32>
    %124 = arith.addf %121, %123 : vector<8x512xf32>
    %125 = vector.extract_strided_slice %124 {offsets = [0, 0], sizes = [8, 128], strides = [1, 1]} : vector<8x512xf32> to vector<8x128xf32>
    %126 = arith.negf %125 : vector<8x128xf32>
    %127 = math.exp %126 : vector<8x128xf32>
    %cst_39 = arith.constant 1.000000e+00 : f32
    %128 = vector.broadcast %cst_39 : f32 to vector<8x128xf32>
    %129 = arith.addf %128, %127 : vector<8x128xf32>
    %130 = arith.divf %128, %129 : vector<8x128xf32>
    %131 = vector.extract_strided_slice %124 {offsets = [0, 128], sizes = [8, 128], strides = [1, 1]} : vector<8x512xf32> to vector<8x128xf32>
    %132 = arith.negf %131 : vector<8x128xf32>
    %133 = math.exp %132 : vector<8x128xf32>
    %cst_40 = arith.constant 1.000000e+00 : f32
    %134 = vector.broadcast %cst_40 : f32 to vector<8x128xf32>
    %135 = arith.addf %134, %133 : vector<8x128xf32>
    %136 = arith.divf %134, %135 : vector<8x128xf32>
    %137 = vector.extract_strided_slice %124 {offsets = [0, 256], sizes = [8, 128], strides = [1, 1]} : vector<8x512xf32> to vector<8x128xf32>
    %138 = math.tanh %137 : vector<8x128xf32>
    %139 = vector.extract_strided_slice %124 {offsets = [0, 384], sizes = [8, 128], strides = [1, 1]} : vector<8x512xf32> to vector<8x128xf32>
    %140 = arith.negf %139 : vector<8x128xf32>
    %141 = math.exp %140 : vector<8x128xf32>
    %cst_41 = arith.constant 1.000000e+00 : f32
    %142 = vector.broadcast %cst_41 : f32 to vector<8x128xf32>
    %143 = arith.addf %142, %141 : vector<8x128xf32>
    %144 = arith.divf %142, %143 : vector<8x128xf32>
    %145 = arith.mulf %136, %111 : vector<8x128xf32>
    %146 = arith.mulf %130, %138 : vector<8x128xf32>
    %147 = arith.addf %145, %146 : vector<8x128xf32>
    %148 = math.tanh %147 : vector<8x128xf32>
    %149 = arith.mulf %144, %148 : vector<8x128xf32>
    %150 = arith.index_cast %c3_i32 : i32 to index
    %c0_42 = arith.constant 0 : index
    %c0_43 = arith.constant 0 : index
    %151 = vector.load %arg6[%150, %c0_42, %c0_43] : memref<8x8x128xf32, #tpu.memory_space<vmem>>, vector<1x8x128xf32>
    %152 = vector.shape_cast %151 : vector<1x8x128xf32> to vector<8x128xf32>
    %153 = vector.shape_cast %149 : vector<8x128xf32> to vector<1x8x128xf32>
    tpu.vector_store %arg6[%150, %c0_42, %c0_43], %153 {strides = array<i32>} : memref<8x8x128xf32, #tpu.memory_space<vmem>>, vector<1x8x128xf32>,
    %c4_i32 = arith.constant 4 : i32
    %c8_i32_44 = arith.constant 8 : i32
    %154 = arith.muli %c4_i32, %c8_i32_44 : i32
    %155 = tpu.assume_multiple %154, 8 : i32
    %156 = arith.index_cast %155 : i32 to index
    %c0_45 = arith.constant 0 : index
    %157 = vector.load %arg8[%156, %c0_45] : memref<64x512xf32, #tpu.memory_space<vmem>>, vector<8x512xf32>
    %158 = arith.truncf %149 : vector<8x128xf32> to vector<8x128xbf16>
    %cst_46 = arith.constant dense<0.000000e+00> : vector<8x512xf32>
    %159 = tpu.matmul %158, %7, %cst_46 {dimension_numbers = #tpu.dot_dimension_numbers<[1], [0], [0], [1], [0, 0, 1, 1], [], []>} : vector<8x128xbf16>, vector<128x512xbf16>, vector<8x512xf32> -> vector<8x512xf32>
    %160 = arith.addf %157, %159 : vector<8x512xf32>
    %161 = vector.extract_strided_slice %160 {offsets = [0, 0], sizes = [8, 128], strides = [1, 1]} : vector<8x512xf32> to vector<8x128xf32>
    %162 = arith.negf %161 : vector<8x128xf32>
    %163 = math.exp %162 : vector<8x128xf32>
    %cst_47 = arith.constant 1.000000e+00 : f32
    %164 = vector.broadcast %cst_47 : f32 to vector<8x128xf32>
    %165 = arith.addf %164, %163 : vector<8x128xf32>
    %166 = arith.divf %164, %165 : vector<8x128xf32>
    %167 = vector.extract_strided_slice %160 {offsets = [0, 128], sizes = [8, 128], strides = [1, 1]} : vector<8x512xf32> to vector<8x128xf32>
    %168 = arith.negf %167 : vector<8x128xf32>
    %169 = math.exp %168 : vector<8x128xf32>
    %cst_48 = arith.constant 1.000000e+00 : f32
    %170 = vector.broadcast %cst_48 : f32 to vector<8x128xf32>
    %171 = arith.addf %170, %169 : vector<8x128xf32>
    %172 = arith.divf %170, %171 : vector<8x128xf32>
    %173 = vector.extract_strided_slice %160 {offsets = [0, 256], sizes = [8, 128], strides = [1, 1]} : vector<8x512xf32> to vector<8x128xf32>
    %174 = math.tanh %173 : vector<8x128xf32>
    %175 = vector.extract_strided_slice %160 {offsets = [0, 384], sizes = [8, 128], strides = [1, 1]} : vector<8x512xf32> to vector<8x128xf32>
    %176 = arith.negf %175 : vector<8x128xf32>
    %177 = math.exp %176 : vector<8x128xf32>
    %cst_49 = arith.constant 1.000000e+00 : f32
    %178 = vector.broadcast %cst_49 : f32 to vector<8x128xf32>
    %179 = arith.addf %178, %177 : vector<8x128xf32>
    %180 = arith.divf %178, %179 : vector<8x128xf32>
    %181 = arith.mulf %172, %147 : vector<8x128xf32>
    %182 = arith.mulf %166, %174 : vector<8x128xf32>
    %183 = arith.addf %181, %182 : vector<8x128xf32>
    %184 = math.tanh %183 : vector<8x128xf32>
    %185 = arith.mulf %180, %184 : vector<8x128xf32>
    %186 = arith.index_cast %c4_i32 : i32 to index
    %c0_50 = arith.constant 0 : index
    %c0_51 = arith.constant 0 : index
    %187 = vector.load %arg6[%186, %c0_50, %c0_51] : memref<8x8x128xf32, #tpu.memory_space<vmem>>, vector<1x8x128xf32>
    %188 = vector.shape_cast %187 : vector<1x8x128xf32> to vector<8x128xf32>
    %189 = vector.shape_cast %185 : vector<8x128xf32> to vector<1x8x128xf32>
    tpu.vector_store %arg6[%186, %c0_50, %c0_51], %189 {strides = array<i32>} : memref<8x8x128xf32, #tpu.memory_space<vmem>>, vector<1x8x128xf32>,
    %c5_i32 = arith.constant 5 : i32
    %c8_i32_52 = arith.constant 8 : i32
    %190 = arith.muli %c5_i32, %c8_i32_52 : i32
    %191 = tpu.assume_multiple %190, 8 : i32
    %192 = arith.index_cast %191 : i32 to index
    %c0_53 = arith.constant 0 : index
    %193 = vector.load %arg8[%192, %c0_53] : memref<64x512xf32, #tpu.memory_space<vmem>>, vector<8x512xf32>
    %194 = arith.truncf %185 : vector<8x128xf32> to vector<8x128xbf16>
    %cst_54 = arith.constant dense<0.000000e+00> : vector<8x512xf32>
    %195 = tpu.matmul %194, %7, %cst_54 {dimension_numbers = #tpu.dot_dimension_numbers<[1], [0], [0], [1], [0, 0, 1, 1], [], []>} : vector<8x128xbf16>, vector<128x512xbf16>, vector<8x512xf32> -> vector<8x512xf32>
    %196 = arith.addf %193, %195 : vector<8x512xf32>
    %197 = vector.extract_strided_slice %196 {offsets = [0, 0], sizes = [8, 128], strides = [1, 1]} : vector<8x512xf32> to vector<8x128xf32>
    %198 = arith.negf %197 : vector<8x128xf32>
    %199 = math.exp %198 : vector<8x128xf32>
    %cst_55 = arith.constant 1.000000e+00 : f32
    %200 = vector.broadcast %cst_55 : f32 to vector<8x128xf32>
    %201 = arith.addf %200, %199 : vector<8x128xf32>
    %202 = arith.divf %200, %201 : vector<8x128xf32>
    %203 = vector.extract_strided_slice %196 {offsets = [0, 128], sizes = [8, 128], strides = [1, 1]} : vector<8x512xf32> to vector<8x128xf32>
    %204 = arith.negf %203 : vector<8x128xf32>
    %205 = math.exp %204 : vector<8x128xf32>
    %cst_56 = arith.constant 1.000000e+00 : f32
    %206 = vector.broadcast %cst_56 : f32 to vector<8x128xf32>
    %207 = arith.addf %206, %205 : vector<8x128xf32>
    %208 = arith.divf %206, %207 : vector<8x128xf32>
    %209 = vector.extract_strided_slice %196 {offsets = [0, 256], sizes = [8, 128], strides = [1, 1]} : vector<8x512xf32> to vector<8x128xf32>
    %210 = math.tanh %209 : vector<8x128xf32>
    %211 = vector.extract_strided_slice %196 {offsets = [0, 384], sizes = [8, 128], strides = [1, 1]} : vector<8x512xf32> to vector<8x128xf32>
    %212 = arith.negf %211 : vector<8x128xf32>
    %213 = math.exp %212 : vector<8x128xf32>
    %cst_57 = arith.constant 1.000000e+00 : f32
    %214 = vector.broadcast %cst_57 : f32 to vector<8x128xf32>
    %215 = arith.addf %214, %213 : vector<8x128xf32>
    %216 = arith.divf %214, %215 : vector<8x128xf32>
    %217 = arith.mulf %208, %183 : vector<8x128xf32>
    %218 = arith.mulf %202, %210 : vector<8x128xf32>
    %219 = arith.addf %217, %218 : vector<8x128xf32>
    %220 = math.tanh %219 : vector<8x128xf32>
    %221 = arith.mulf %216, %220 : vector<8x128xf32>
    %222 = arith.index_cast %c5_i32 : i32 to index
    %c0_58 = arith.constant 0 : index
    %c0_59 = arith.constant 0 : index
    %223 = vector.load %arg6[%222, %c0_58, %c0_59] : memref<8x8x128xf32, #tpu.memory_space<vmem>>, vector<1x8x128xf32>
    %224 = vector.shape_cast %223 : vector<1x8x128xf32> to vector<8x128xf32>
    %225 = vector.shape_cast %221 : vector<8x128xf32> to vector<1x8x128xf32>
    tpu.vector_store %arg6[%222, %c0_58, %c0_59], %225 {strides = array<i32>} : memref<8x8x128xf32, #tpu.memory_space<vmem>>, vector<1x8x128xf32>,
    %c6_i32 = arith.constant 6 : i32
    %c8_i32_60 = arith.constant 8 : i32
    %226 = arith.muli %c6_i32, %c8_i32_60 : i32
    %227 = tpu.assume_multiple %226, 8 : i32
    %228 = arith.index_cast %227 : i32 to index
    %c0_61 = arith.constant 0 : index
    %229 = vector.load %arg8[%228, %c0_61] : memref<64x512xf32, #tpu.memory_space<vmem>>, vector<8x512xf32>
    %230 = arith.truncf %221 : vector<8x128xf32> to vector<8x128xbf16>
    %cst_62 = arith.constant dense<0.000000e+00> : vector<8x512xf32>
    %231 = tpu.matmul %230, %7, %cst_62 {dimension_numbers = #tpu.dot_dimension_numbers<[1], [0], [0], [1], [0, 0, 1, 1], [], []>} : vector<8x128xbf16>, vector<128x512xbf16>, vector<8x512xf32> -> vector<8x512xf32>
    %232 = arith.addf %229, %231 : vector<8x512xf32>
    %233 = vector.extract_strided_slice %232 {offsets = [0, 0], sizes = [8, 128], strides = [1, 1]} : vector<8x512xf32> to vector<8x128xf32>
    %234 = arith.negf %233 : vector<8x128xf32>
    %235 = math.exp %234 : vector<8x128xf32>
    %cst_63 = arith.constant 1.000000e+00 : f32
    %236 = vector.broadcast %cst_63 : f32 to vector<8x128xf32>
    %237 = arith.addf %236, %235 : vector<8x128xf32>
    %238 = arith.divf %236, %237 : vector<8x128xf32>
    %239 = vector.extract_strided_slice %232 {offsets = [0, 128], sizes = [8, 128], strides = [1, 1]} : vector<8x512xf32> to vector<8x128xf32>
    %240 = arith.negf %239 : vector<8x128xf32>
    %241 = math.exp %240 : vector<8x128xf32>
    %cst_64 = arith.constant 1.000000e+00 : f32
    %242 = vector.broadcast %cst_64 : f32 to vector<8x128xf32>
    %243 = arith.addf %242, %241 : vector<8x128xf32>
    %244 = arith.divf %242, %243 : vector<8x128xf32>
    %245 = vector.extract_strided_slice %232 {offsets = [0, 256], sizes = [8, 128], strides = [1, 1]} : vector<8x512xf32> to vector<8x128xf32>
    %246 = math.tanh %245 : vector<8x128xf32>
    %247 = vector.extract_strided_slice %232 {offsets = [0, 384], sizes = [8, 128], strides = [1, 1]} : vector<8x512xf32> to vector<8x128xf32>
    %248 = arith.negf %247 : vector<8x128xf32>
    %249 = math.exp %248 : vector<8x128xf32>
    %cst_65 = arith.constant 1.000000e+00 : f32
    %250 = vector.broadcast %cst_65 : f32 to vector<8x128xf32>
    %251 = arith.addf %250, %249 : vector<8x128xf32>
    %252 = arith.divf %250, %251 : vector<8x128xf32>
    %253 = arith.mulf %244, %219 : vector<8x128xf32>
    %254 = arith.mulf %238, %246 : vector<8x128xf32>
    %255 = arith.addf %253, %254 : vector<8x128xf32>
    %256 = math.tanh %255 : vector<8x128xf32>
    %257 = arith.mulf %252, %256 : vector<8x128xf32>
    %258 = arith.index_cast %c6_i32 : i32 to index
    %c0_66 = arith.constant 0 : index
    %c0_67 = arith.constant 0 : index
    %259 = vector.load %arg6[%258, %c0_66, %c0_67] : memref<8x8x128xf32, #tpu.memory_space<vmem>>, vector<1x8x128xf32>
    %260 = vector.shape_cast %259 : vector<1x8x128xf32> to vector<8x128xf32>
    %261 = vector.shape_cast %257 : vector<8x128xf32> to vector<1x8x128xf32>
    tpu.vector_store %arg6[%258, %c0_66, %c0_67], %261 {strides = array<i32>} : memref<8x8x128xf32, #tpu.memory_space<vmem>>, vector<1x8x128xf32>,
    %c7_i32 = arith.constant 7 : i32
    %c8_i32_68 = arith.constant 8 : i32
    %262 = arith.muli %c7_i32, %c8_i32_68 : i32
    %263 = tpu.assume_multiple %262, 8 : i32
    %264 = arith.index_cast %263 : i32 to index
    %c0_69 = arith.constant 0 : index
    %265 = vector.load %arg8[%264, %c0_69] : memref<64x512xf32, #tpu.memory_space<vmem>>, vector<8x512xf32>
    %266 = arith.truncf %257 : vector<8x128xf32> to vector<8x128xbf16>
    %cst_70 = arith.constant dense<0.000000e+00> : vector<8x512xf32>
    %267 = tpu.matmul %266, %7, %cst_70 {dimension_numbers = #tpu.dot_dimension_numbers<[1], [0], [0], [1], [0, 0, 1, 1], [], []>} : vector<8x128xbf16>, vector<128x512xbf16>, vector<8x512xf32> -> vector<8x512xf32>
    %268 = arith.addf %265, %267 : vector<8x512xf32>
    %269 = vector.extract_strided_slice %268 {offsets = [0, 0], sizes = [8, 128], strides = [1, 1]} : vector<8x512xf32> to vector<8x128xf32>
    %270 = arith.negf %269 : vector<8x128xf32>
    %271 = math.exp %270 : vector<8x128xf32>
    %cst_71 = arith.constant 1.000000e+00 : f32
    %272 = vector.broadcast %cst_71 : f32 to vector<8x128xf32>
    %273 = arith.addf %272, %271 : vector<8x128xf32>
    %274 = arith.divf %272, %273 : vector<8x128xf32>
    %275 = vector.extract_strided_slice %268 {offsets = [0, 128], sizes = [8, 128], strides = [1, 1]} : vector<8x512xf32> to vector<8x128xf32>
    %276 = arith.negf %275 : vector<8x128xf32>
    %277 = math.exp %276 : vector<8x128xf32>
    %cst_72 = arith.constant 1.000000e+00 : f32
    %278 = vector.broadcast %cst_72 : f32 to vector<8x128xf32>
    %279 = arith.addf %278, %277 : vector<8x128xf32>
    %280 = arith.divf %278, %279 : vector<8x128xf32>
    %281 = vector.extract_strided_slice %268 {offsets = [0, 256], sizes = [8, 128], strides = [1, 1]} : vector<8x512xf32> to vector<8x128xf32>
    %282 = math.tanh %281 : vector<8x128xf32>
    %283 = vector.extract_strided_slice %268 {offsets = [0, 384], sizes = [8, 128], strides = [1, 1]} : vector<8x512xf32> to vector<8x128xf32>
    %284 = arith.negf %283 : vector<8x128xf32>
    %285 = math.exp %284 : vector<8x128xf32>
    %cst_73 = arith.constant 1.000000e+00 : f32
    %286 = vector.broadcast %cst_73 : f32 to vector<8x128xf32>
    %287 = arith.addf %286, %285 : vector<8x128xf32>
    %288 = arith.divf %286, %287 : vector<8x128xf32>
    %289 = arith.mulf %280, %255 : vector<8x128xf32>
    %290 = arith.mulf %274, %282 : vector<8x128xf32>
    %291 = arith.addf %289, %290 : vector<8x128xf32>
    %292 = math.tanh %291 : vector<8x128xf32>
    %293 = arith.mulf %288, %292 : vector<8x128xf32>
    %294 = arith.index_cast %c7_i32 : i32 to index
    %c0_74 = arith.constant 0 : index
    %c0_75 = arith.constant 0 : index
    %295 = vector.load %arg6[%294, %c0_74, %c0_75] : memref<8x8x128xf32, #tpu.memory_space<vmem>>, vector<1x8x128xf32>
    %296 = vector.shape_cast %295 : vector<1x8x128xf32> to vector<8x128xf32>
    %297 = vector.shape_cast %293 : vector<8x128xf32> to vector<1x8x128xf32>
    tpu.vector_store %arg6[%294, %c0_74, %c0_75], %297 {strides = array<i32>} : memref<8x8x128xf32, #tpu.memory_space<vmem>>, vector<1x8x128xf32>,
    %c8_i32_76 = arith.constant 8 : i32
    %c0_77 = arith.constant 0 : index
    %c0_78 = arith.constant 0 : index
    %298 = vector.load %arg7[%c0_77, %c0_78] : memref<8x128xf32, #tpu.memory_space<vmem>>, vector<8x128xf32>
    tpu.vector_store %arg7[%c0_77, %c0_78], %291 {strides = array<i32>} : memref<8x128xf32, #tpu.memory_space<vmem>>, vector<8x128xf32>,
    return
  }
}

</mosaic_0001>

<bundles_post_ra>
// kernel: my_lstm_forward.1
= control target key start
LH: loop header
LB: loop body
LE: loop exit
PB: predicated region body
PF: predicated region fallthrough
CT: control target
= control target key end

     0   :  { %v2591_v1 = vmov 0   ;;  %vm100_vm0 = vcmask 130048   ;;  %v40_v43 = vlaneseq  ;;  %s2583_s1 = inlined_call_operand.vmem [shape: bf16[16,512], index: 1, kind: input, shape index: {}]   ;;  %s2584_s0 = inlined_call_operand.vmem [shape: bf16[64,16], index: 0, kind: input, shape index: {}]   ;;  %s2585_s2 = inlined_call_operand.vmem [shape: bf16[128,512], index: 2, kind: input, shape index: {}]   ;;  %s2586_s4 = inlined_call_operand.vmem [shape: f32[8,128], index: 4, kind: input, shape index: {}]   ;;  %s2587_s3 = inlined_call_operand.vmem [shape: f32[1,512], index: 3, kind: input, shape index: {}]   ;;  %s2588_s5 = inlined_call_operand.vmem [shape: f32[8,128], index: 5, kind: input, shape index: {}]   ;;  %s2589_s6 = inlined_call_operand.vmem [shape: f32[8,8,128], index: 6, kind: output, shape index: {0}]   ;;  %s2590_s7 = inlined_call_operand.vmem [shape: f32[8,128], index: 7, kind: output, shape index: {1}]  }
   0x1   :  { %v1540_v0 = vld [vmem:[%s2583_s1 + $0x4] ss:$16 sps:$4 sm:$0xff]   ;;  %145 = vmatprep.mubr.bf16.mxu0 %v2591_v1  ;;  %218 = vmatprep.mubr.bf16.mxu1 %v2591_v1  ;;  %v1542_v2 = vld [vmem:[%s2583_s1 + $0xc] ss:$16 sps:$4 sm:$0xff]   ;;  %v1544_v3 = vld [vmem:[%s2583_s1] ss:$16 sps:$4 sm:$0xff]  }
   0x2   :  { %113 = vmatprep.subr.bf16.mxu0 %v1540_v0  ;;  %v1545_v4 = vld [vmem:[%s2583_s1 + $0x8] ss:$16 sps:$4 sm:$0xff]   ;;  %186 = vmatprep.subr.bf16.mxu1 %v1542_v2  ;;  %v1546_v5 = vld [vmem:[%s2584_s0] sm:$0xff]   ;;  %v1824_v7 = vld [vmem:[%s2585_s2 + $0xc] ss:$16 sps:$4 sm:$0xff]   ;;  %v41_v44 = vshrl.u32 %v40_v43, 7 }
   0x3   :  { %114 = vmatpush1.bf16.msra.mxu0 %v1544_v3  ;;  %187 = vmatpush1.bf16.msra.mxu1 %v1545_v4  ;;  %v1819_v6 = vld [vmem:[%s2585_s2 + $0x4] ss:$16 sps:$4 sm:$0xff]   ;;  %v1829_v8 = vld [vmem:[%s2585_s2] ss:$16 sps:$4 sm:$0xff]   ;;  %v1835_v9 = vld [vmem:[%s2585_s2 + $0x8] ss:$16 sps:$4 sm:$0xff]  }
   0x4   :  { %493 = vmatprep.subr.bf16.mxu0 %v1819_v6  ;;  %v1842_v10 = vld [vmem:[%s2585_s2 + $0x24] ss:$16 sps:$4 sm:$0xff]   ;;  %534 = vmatprep.subr.bf16.mxu1 %v1824_v7  ;;  %v1849_v11 = vld [vmem:[%s2585_s2 + $0x2c] ss:$16 sps:$4 sm:$0xff]   ;;  %v1854_v12 = vld [vmem:[%s2585_s2 + $0x20] ss:$16 sps:$4 sm:$0xff]  }
   0x5   :  { %v1859_v13 = vld [vmem:[%s2585_s2 + $0x28] ss:$16 sps:$4 sm:$0xff]   ;;  %v1871_v15 = vld [vmem:[%s2585_s2 + $0x44] ss:$16 sps:$4 sm:$0xff]   ;;  %v1877_v16 = vld [vmem:[%s2585_s2 + $0x4c] ss:$16 sps:$4 sm:$0xff]  }
   0x6   :  { %1468 = vmatmul.mubr.msk.bf16.vlgmr.msra.gmra.mrb[0].mxu0 %vm100_vm0, %v1546_v5  ;;  %1472 = vmatmul.mubr.msk.bf16.vlgmr.msra.gmra.mrb[0].mxu1 %vm100_vm0, %v1546_v5  ;;  %v1559_v14 = vld [vmem:[%s2584_s0 + $0x8] sm:$0xff]   ;;  %v1883_v17 = vld [vmem:[%s2585_s2 + $0x40] ss:$16 sps:$4 sm:$0xff]   ;;  %v1895_v19 = vld [vmem:[%s2585_s2 + $0x64] ss:$16 sps:$4 sm:$0xff]   ;;  %v50_v45 = vsub.s32 2, %v41_v44 }
   0x7   :  { %494 = vmatpush1.bf16.msra.mxu0 %v1829_v8  ;;  %535 = vmatpush1.bf16.msra.mxu1 %v1835_v9  ;;  %v1888_v18 = vld [vmem:[%s2585_s2 + $0x48] ss:$16 sps:$4 sm:$0xff]   ;;  %v1901_v20 = vld [vmem:[%s2585_s2 + $0x6c] ss:$16 sps:$4 sm:$0xff]   ;;  %v1908_v21 = vld [vmem:[%s2585_s2 + $0x60] ss:$16 sps:$4 sm:$0xff]  }
   0x8   :  { %495 = vmatprep.subr.bf16.mxu0 %v1842_v10  ;;  %536 = vmatprep.subr.bf16.mxu1 %v1849_v11  ;;  %v1914_v22 = vld [vmem:[%s2585_s2 + $0x68] ss:$16 sps:$4 sm:$0xff]   ;;  %v1922_v23 = vld [vmem:[%s2585_s2 + $0x84] ss:$16 sps:$4 sm:$0xff]   ;;  %v1929_v24 = vld [vmem:[%s2585_s2 + $0x8c] ss:$16 sps:$4 sm:$0xff]  }
   0x9   :  { %155 = vmatprep.mubr.bf16.mxu0 %v2591_v1  ;;  %228 = vmatprep.mubr.bf16.mxu1 %v2591_v1  ;;  %v1572_v25 = vld [vmem:[%s2584_s0 + $0x10] sm:$0xff]   ;;  %v1945_v27 = vld [vmem:[%s2585_s2 + $0x88] ss:$16 sps:$4 sm:$0xff]   ;;  %v1956_v29 = vld [vmem:[%s2585_s2 + $0xac] ss:$16 sps:$4 sm:$0xff]   ;;  %v54_v46 = vsub.s32 3, %v41_v44 }
   0xa   :  { %v1938_v26 = vld [vmem:[%s2585_s2 + $0x80] ss:$16 sps:$4 sm:$0xff]   ;;  %v1950_v28 = vld [vmem:[%s2585_s2 + $0xa4] ss:$16 sps:$4 sm:$0xff]   ;;  %v1969_v31 = vld [vmem:[%s2585_s2 + $0xa8] ss:$16 sps:$4 sm:$0xff]  }
   0xb   :  { %496 = vmatpush1.bf16.msra.mxu0 %v1854_v12  ;;  %537 = vmatpush1.bf16.msra.mxu1 %v1859_v13  ;;  %v1964_v30 = vld [vmem:[%s2585_s2 + $0xa0] ss:$16 sps:$4 sm:$0xff]   ;;  %v1977_v32 = vld [vmem:[%s2585_s2 + $0xc4] ss:$16 sps:$4 sm:$0xff]   ;;  %v1984_v33 = vld [vmem:[%s2585_s2 + $0xcc] ss:$16 sps:$4 sm:$0xff]  }
   0xc   :  { %497 = vmatprep.subr.bf16.mxu0 %v1871_v15  ;;  %538 = vmatprep.subr.bf16.mxu1 %v1877_v16  ;;  %v1585_v34 = vld [vmem:[%s2584_s0 + $0x18] sm:$0xff]   ;;  %v1993_v35 = vld [vmem:[%s2585_s2 + $0xc0] ss:$16 sps:$4 sm:$0xff]   ;;  %v2005_v37 = vld [vmem:[%s2585_s2 + $0xe4] ss:$16 sps:$4 sm:$0xff]   ;;  %v42_v47 = vsub.s32 0, %v41_v44 }
   0xd   :  { %v2000_v36 = vld [vmem:[%s2585_s2 + $0xc8] ss:$16 sps:$4 sm:$0xff]   ;;  %v2011_v38 = vld [vmem:[%s2585_s2 + $0xec] ss:$16 sps:$4 sm:$0xff]   ;;  %v2019_v39 = vld [vmem:[%s2585_s2 + $0xe0] ss:$16 sps:$4 sm:$0xff]  }
   0xe   :  { %1469 = vmatmul.mubr.msk.bf16.gmra.mrb[4].mxu0 %vm100_vm0, %v1559_v14  ;;  %1473 = vmatmul.mubr.msk.bf16.gmra.mrb[4].mxu1 %vm100_vm0, %v1559_v14  ;;  %v323_v40 = vld [vmem:[%s2586_s4] sm:$0xff]  ;;  %v2030_v41 = vld [vmem:[%s2585_s2 + $0xe8] ss:$16 sps:$4 sm:$0xff]   ;;  %v46_v49 = vsub.s32 1, %v41_v44 }
   0xf   :  { %498 = vmatpush1.bf16.msra.mxu0 %v1883_v17  ;;  %165 = vmatprep.mubr.bf16.mxu0 %v2591_v1  ;;  %v332_v42 = vpack.c.bf16 %v323_v40, %v323_v40  ;;  %v38_v48 = vld [vmem:[%s2587_s3] sm:$0xf] }
  0x10   :  { %539 = vmatpush1.bf16.msra.mxu1 %v1888_v18  ;;  %499 = vmatprep.subr.bf16.mxu0 %v1895_v19  ;;  %v2075_v50 = vrot.slane %v38_v48, %v50_v45  ;;  %v2081_v53 = vrot.slane %v38_v48, %v54_v46  ;;  %v43_v54 = vrot.slane %v38_v48, %v42_v47 }
  0x11   :  { %540 = vmatprep.subr.bf16.mxu1 %v1901_v20  ;;  %238 = vmatprep.mubr.bf16.mxu1 %v2591_v1  ;;  %v47_v57 = vrot.slane %v38_v48, %v46_v49 }
  0x13   :  { %500 = vmatpush1.bf16.msra.mxu0 %v1908_v21 }
  0x14   :  { %541 = vmatpush1.bf16.msra.mxu1 %v1914_v22  ;;  %501 = vmatprep.subr.bf16.mxu0 %v1922_v23 }
  0x15   :  { %542 = vmatprep.subr.bf16.mxu1 %v1929_v24 }
  0x16   :  { %1470 = vmatmul.mubr.msk.bf16.gmra.mrb[8].mxu0 %vm100_vm0, %v1572_v25  ;;  %1474 = vmatmul.mubr.msk.bf16.gmra.mrb[8].mxu1 %vm100_vm0, %v1572_v25 }
  0x17   :  { %502 = vmatpush1.bf16.msra.mxu0 %v1938_v26  ;;  %175 = vmatprep.mubr.bf16.mxu0 %v2591_v1 }
  0x18   :  { %543 = vmatpush1.bf16.msra.mxu1 %v1945_v27  ;;  %503 = vmatprep.subr.bf16.mxu0 %v1950_v28 }
  0x19   :  { %544 = vmatprep.subr.bf16.mxu1 %v1956_v29  ;;  %248 = vmatprep.mubr.bf16.mxu1 %v2591_v1 }
  0x1b   :  { %504 = vmatpush1.bf16.msra.mxu0 %v1964_v30 }
  0x1c   :  { %545 = vmatpush1.bf16.msra.mxu1 %v1969_v31  ;;  %505 = vmatprep.subr.bf16.mxu0 %v1977_v32 }
  0x1d   :  { %546 = vmatprep.subr.bf16.mxu1 %v1984_v33 }
  0x1e   :  { %1471 = vmatmul.mubr.msk.bf16.gmra.mrb[12].mxu0 %vm100_vm0, %v1585_v34  ;;  %1475 = vmatmul.mubr.msk.bf16.gmra.mrb[12].mxu1 %vm100_vm0, %v1585_v34 }
  0x1f   :  { %506 = vmatpush1.bf16.msra.mxu0 %v1993_v35  ;;  %525 = vmatprep.mubr.bf16.mxu0 %v2591_v1 }
  0x20   :  { %547 = vmatpush1.bf16.msra.mxu1 %v2000_v36  ;;  %507 = vmatprep.subr.bf16.mxu0 %v2005_v37 }
  0x21   :  { %548 = vmatprep.subr.bf16.mxu1 %v2011_v38  ;;  %566 = vmatprep.mubr.bf16.mxu1 %v2591_v1 }
  0x23   :  { %508 = vmatpush1.bf16.msra.mxu0 %v2019_v39 }
  0x24   :  { %549 = vmatpush1.bf16.msra.mxu1 %v2030_v41  ;;  %612 = vmatprep.subr.bf16.mxu0 %v1819_v6 }
  0x25   :  { %653 = vmatprep.subr.bf16.mxu1 %v1824_v7 }
  0x26   :  { %526 = vmatmul.mubr.bf16.vlgmr.msra.gmra.mrb[16].mxu0 %v332_v42 }
  0x27   :  { %567 = vmatmul.mubr.bf16.vlgmr.msra.gmra.mrb[16].mxu1 %v332_v42  ;;  %613 = vmatpush1.bf16.msra.mxu0 %v1829_v8 }
  0x28   :  { %654 = vmatpush1.bf16.msra.mxu1 %v1835_v9  ;;  %614 = vmatprep.subr.bf16.mxu0 %v1842_v10 }
  0x29   :  { %655 = vmatprep.subr.bf16.mxu1 %v1849_v11  ;;  %644 = vmatprep.mubr.bf16.mxu0 %v2591_v1 }
  0x2a   :  { %685 = vmatprep.mubr.bf16.mxu1 %v2591_v1 }
  0x2b   :  { %615 = vmatpush1.bf16.msra.mxu0 %v1854_v12 }
  0x2c   :  { %656 = vmatpush1.bf16.msra.mxu1 %v1859_v13  ;;  %616 = vmatprep.subr.bf16.mxu0 %v1871_v15 }
  0x2d   :  { %657 = vmatprep.subr.bf16.mxu1 %v1877_v16 }
  0x2f   :  { %617 = vmatpush1.bf16.msra.mxu0 %v1883_v17 }
  0x30   :  { %658 = vmatpush1.bf16.msra.mxu1 %v1888_v18  ;;  %618 = vmatprep.subr.bf16.mxu0 %v1895_v19 }
  0x31   :  { %659 = vmatprep.subr.bf16.mxu1 %v1901_v20 }
  0x33   :  { %619 = vmatpush1.bf16.msra.mxu0 %v1908_v21 }
  0x34   :  { %660 = vmatpush1.bf16.msra.mxu1 %v1914_v22  ;;  %620 = vmatprep.subr.bf16.mxu0 %v1922_v23 }
  0x35   :  { %661 = vmatprep.subr.bf16.mxu1 %v1929_v24 }
  0x37   :  { %621 = vmatpush1.bf16.msra.mxu0 %v1938_v26 }
  0x38   :  { %662 = vmatpush1.bf16.msra.mxu1 %v1945_v27  ;;  %622 = vmatprep.subr.bf16.mxu0 %v1950_v28 }
  0x39   :  { %663 = vmatprep.subr.bf16.mxu1 %v1956_v29 }
  0x3b   :  { %623 = vmatpush1.bf16.msra.mxu0 %v1964_v30 }
  0x3c   :  { %664 = vmatpush1.bf16.msra.mxu1 %v1969_v31  ;;  %624 = vmatprep.subr.bf16.mxu0 %v1977_v32 }
  0x3d   :  { %665 = vmatprep.subr.bf16.mxu1 %v1984_v33 }
  0x3f   :  { %625 = vmatpush1.bf16.msra.mxu0 %v1993_v35 }
  0x40   :  { %666 = vmatpush1.bf16.msra.mxu1 %v2000_v36  ;;  %626 = vmatprep.subr.bf16.mxu0 %v2005_v37 }
  0x41   :  { %667 = vmatprep.subr.bf16.mxu1 %v2011_v38 }
  0x43   :  { %627 = vmatpush1.bf16.msra.mxu0 %v2019_v39 }
  0x44   :  { %668 = vmatpush1.bf16.msra.mxu1 %v2030_v41  ;;  %732 = vmatprep.subr.bf16.mxu0 %v1819_v6 }
  0x45   :  { %773 = vmatprep.subr.bf16.mxu1 %v1824_v7 }
  0xd9   :  { %v2077_v51 = vpop.f32.mrb[0].mxu0  ;;  %v2079_v52 = vpop.f32.mrb[0].mxu1 }
  0xda   :  { %v149_v55 = vpop.f32.mrb[1].mxu0  ;;  %v222_v56 = vpop.f32.mrb[1].mxu1 }
  0xdb   :  { %v151_v58 = vpop.f32.mrb[2].mxu0  ;;  %v224_v59 = vpop.f32.mrb[2].mxu1 }
  0xdc   :  { %v2083_v60 = vadd.f32 %v151_v58, %v43_v54  ;;  %v153_v61 = vpop.f32.mrb[3].mxu0  ;;  %v2086_v62 = vadd.f32 %v224_v59, %v2075_v50  ;;  %v226_v63 = vpop.f32.mrb[3].mxu1 }
  0xdd   :  { %v2088_v0 = vadd.f32 %v153_v61, %v47_v57  ;;  %v2091_v2 = vadd.f32 %v226_v63, %v2081_v53 }
  0xe1   :  { %v157_v3 = vpop.f32.mrb[4].mxu0  ;;  %v230_v4 = vpop.f32.mrb[4].mxu1 }
  0xe2   :  { %v2093_v5 = vadd.f32 %v157_v3, %v43_v54  ;;  %v159_v14 = vpop.f32.mrb[5].mxu0  ;;  %v2096_v25 = vadd.f32 %v230_v4, %v2075_v50  ;;  %v232_v34 = vpop.f32.mrb[5].mxu1 }
  0xe3   :  { %v2098_v40 = vadd.f32 %v159_v14, %v47_v57  ;;  %v161_v42 = vpop.f32.mrb[6].mxu0  ;;  %v2101_v43 = vadd.f32 %v232_v34, %v2081_v53  ;;  %v234_v44 = vpop.f32.mrb[6].mxu1 }
  0xe4   :  { %v2103_v45 = vadd.f32 %v161_v42, %v43_v54  ;;  %v163_v46 = vpop.f32.mrb[7].mxu0  ;;  %v2106_v47 = vadd.f32 %v234_v44, %v2075_v50  ;;  %v236_v48 = vpop.f32.mrb[7].mxu1 }
  0xe5   :  { %2593 = vst [vmem:[#allocation3_spill] sm:$0xff] %v2101_v43  ;;  %v2108_v49 = vadd.f32 %v163_v46, %v47_v57  ;;  %v2111_v58 = vadd.f32 %v236_v48, %v2081_v53 }
  0xe6   :  { %2594 = vst [vmem:[#allocation4_spill] sm:$0xff] %v2103_v45  ;;  %2595 = vst [vmem:[#allocation5_spill] sm:$0xff] %v2106_v47 }
  0xe7   :  { %2596 = vst [vmem:[#allocation6_spill] sm:$0xff] %v2108_v49  ;;  %2597 = vst [vmem:[#allocation7_spill] sm:$0xff] %v2111_v58 }
  0xe9   :  { %v167_v59 = vpop.f32.mrb[8].mxu0  ;;  %v240_v61 = vpop.f32.mrb[8].mxu1 }
  0xea   :  { %v2113_v63 = vadd.f32 %v167_v59, %v43_v54  ;;  %v169_v3 = vpop.f32.mrb[9].mxu0  ;;  %v2116_v4 = vadd.f32 %v240_v61, %v2075_v50  ;;  %v242_v14 = vpop.f32.mrb[9].mxu1 }
  0xeb   :  { %v2118_v34 = vadd.f32 %v169_v3, %v47_v57  ;;  %v171_v42 = vpop.f32.mrb[10].mxu0  ;;  %v2121_v44 = vadd.f32 %v242_v14, %v2081_v53  ;;  %v244_v46 = vpop.f32.mrb[10].mxu1 }
  0xec   :  { %2598 = vst [vmem:[#allocation8_spill] sm:$0xff] %v2113_v63  ;;  %2599 = vst [vmem:[#allocation9_spill] sm:$0xff] %v2116_v4  ;;  %v2123_v1 = vadd.f32 %v171_v42, %v43_v54  ;;  %v173_v48 = vpop.f32.mrb[11].mxu0  ;;  %v2126_v58 = vadd.f32 %v244_v46, %v2075_v50  ;;  %v246_v59 = vpop.f32.mrb[11].mxu1 }
  0xed   :  { %2600 = vst [vmem:[#allocation10_spill] sm:$0xff] %v2118_v34  ;;  %2601 = vst [vmem:[#allocation11_spill] sm:$0xff] %v2121_v44  ;;  %v2128_v63 = vadd.f32 %v173_v48, %v47_v57  ;;  %v2131_v61 = vadd.f32 %v246_v59, %v2081_v53 }
  0xee   :  { %2602 = vst [vmem:[#allocation12_spill] sm:$0xff] %v2123_v1  ;;  %2603 = vst [vmem:[#allocation13_spill] sm:$0xff] %v2126_v58 }
  0xef   :  { %2604 = vst [vmem:[#allocation14_spill] sm:$0xff] %v2128_v63  ;;  %2605 = vst [vmem:[#allocation15_spill] sm:$0xff] %v2131_v61 }
  0xf1   :  { %v177_v4 = vpop.f32.mrb[12].mxu0  ;;  %v250_v3 = vpop.f32.mrb[12].mxu1 }
  0xf2   :  { %v2133_v34 = vadd.f32 %v177_v4, %v43_v54  ;;  %v179_v49 = vpop.f32.mrb[13].mxu0  ;;  %v2136_v14 = vadd.f32 %v250_v3, %v2075_v50  ;;  %v252_v42 = vpop.f32.mrb[13].mxu1 }
  0xf3   :  { %v2138_v1 = vadd.f32 %v179_v49, %v47_v57  ;;  %v181_v44 = vpop.f32.mrb[14].mxu0  ;;  %v2141_v46 = vadd.f32 %v252_v42, %v2081_v53  ;;  %v254_v48 = vpop.f32.mrb[14].mxu1  ;;  %v148_v49 = vadd.f32 %v2077_v51, %v43_v54  ;;  %v221_v42 = vadd.f32 %v2079_v52, %v2075_v50 }
  0xf4   :  { %2606 = vst [vmem:[#allocation16_spill] sm:$0xff] %v2133_v34  ;;  %2607 = vst [vmem:[#allocation17_spill] sm:$0xff] %v2136_v14  ;;  %v2143_v63 = vadd.f32 %v181_v44, %v43_v54  ;;  %v183_v59 = vpop.f32.mrb[15].mxu0  ;;  %v2146_v61 = vadd.f32 %v254_v48, %v2075_v50  ;;  %v256_v4 = vpop.f32.mrb[15].mxu1  ;;  %v223_v44 = vadd.f32 %v222_v56, %v2081_v53 }
  0xf5   :  { %2608 = vst [vmem:[#allocation18_spill] sm:$0xff] %v2138_v1  ;;  %2609 = vst [vmem:[#allocation19_spill] sm:$0xff] %v2141_v46  ;;  %v2148_v34 = vadd.f32 %v183_v59, %v47_v57  ;;  %v2151_v3 = vadd.f32 %v256_v4, %v2081_v53  ;;  %v150_v1 = vadd.f32 %v149_v55, %v47_v57  ;;  %v324_v57 = vld [vmem:[%s2588_s5] sm:$0xff] }
  0xf6   :  { %2610 = vst [vmem:[#allocation20_spill] sm:$0xff] %v2143_v63  ;;  %2611 = vst [vmem:[#allocation21_spill] sm:$0xff] %v2146_v61 }
  0xf7   :  { %2612 = vst [vmem:[#allocation22_spill] sm:$0xff] %v2148_v34  ;;  %2613 = vst [vmem:[#allocation23_spill] sm:$0xff] %v2151_v3 }
  0xf9   :  { %v527_v46 = vpop.f32.mrb[16].mxu0 }
  0xfa   :  { %v575_v63 = vadd.f32 %v527_v46, %v148_v49  ;;  %v568_v14 = vpop.f32.mrb[16].mxu1  ;;  %v529_v58 = vpop.f32.mrb[17].mxu0  ;;  %v2614_v49 = vmov 0  }
  0xfb   :  { %v577_v48 = vadd.f32 %v568_v14, %v221_v42  ;;  %v576_v61 = vadd.f32 %v529_v58, %v150_v1  ;;  %v570_v47 = vpop.f32.mrb[17].mxu1  ;;  %v531_v59 = vpop.f32.mrb[18].mxu0 }
  0xfc   :  { %v1508_v34 = vmul.f32 -1.442695, %v575_v63  ;;  %v578_v45 = vadd.f32 %v570_v47, %v223_v44  ;;  %v532_v4 = vpop.f32.mrb[19].mxu0  ;;  %v572_v3 = vpop.f32.mrb[18].mxu1 }
  0xfd   :  { %v1509_v43 = vmul.f32 -1.442695, %v576_v61  ;;  %v573_v51 = vpop.f32.mrb[19].mxu1 }
  0xfe   :  { %1598 = vpow2.f32 %v1508_v34  ;;  %v1510_v54 = vmul.f32 -1.442695, %v578_v45 }
  0xff   :  { %1600 = vpow2.f32 %v1509_v43 }
 0x100   :  { %1602 = vpow2.f32 %v1510_v54 }
 0x101   :  { %1604 = vtanh.f32 %v577_v48 }
 0x108   :  { %v1599_v50 = vpop.eup %1598 }
 0x109   :  { %v1601_v52 = vpop.eup %1600  ;;  %v582_v55 = vadd.f32 1.0, %v1599_v50 }
 0x10a   :  { %v588_v53 = vadd.f32 1.0, %v1601_v52  ;;  %v1603_v1 = vpop.eup %1602 }
 0x10b   :  { %1606 = vrcp.f32 %v582_v55  ;;  %v1605_v56 = vpop.eup %1604  ;;  %v595_v34 = vadd.f32 1.0, %v1603_v1 }
 0x10c   :  { %1608 = vrcp.f32 %v588_v53 }
 0x10d   :  { %1610 = vrcp.f32 %v595_v34 }
 0x115   :  { %v1607_v47 = vpop.eup %1606 }
 0x116   :  { %v1609_v58 = vpop.eup %1608  ;;  %v599_v63 = vmul.f32 %v1607_v47, %v1605_v56 }
 0x117   :  { %v598_v43 = vmul.f32 %v1609_v58, %v324_v57  ;;  %v1611_v61 = vpop.eup %1610 }
 0x119   :  { %v2160_v45 = vadd.f32 %v599_v63, %v598_v43 }
 0x11b   :  { %1612 = vtanh.f32 %v2160_v45 }
 0x125   :  { %v1613_v14 = vpop.eup %1612 }
 0x126   :  { %v602_v46 = vmul.f32 %v1613_v14, %v1611_v61 }
 0x128   :  { %603 = vst [vmem:[%s2589_s6] sm:$0xff] %v602_v46  ;;  %v611_v3 = vpack.c.bf16 %v602_v46, %v602_v46 }
 0x12a   :  { %645 = vmatmul.mubr.bf16.vlgmr.msra.gmra.mrb[20].mxu0 %v611_v3  ;;  %686 = vmatmul.mubr.bf16.vlgmr.msra.gmra.mrb[20].mxu1 %v611_v3 }
 0x12b   :  { %733 = vmatpush1.bf16.msra.mxu0 %v1829_v8  ;;  %774 = vmatpush1.bf16.msra.mxu1 %v1835_v9 }
 0x12c   :  { %734 = vmatprep.subr.bf16.mxu0 %v1842_v10  ;;  %775 = vmatprep.subr.bf16.mxu1 %v1849_v11 }
 0x12d   :  { %764 = vmatprep.mubr.bf16.mxu0 %v2614_v49  ;;  %805 = vmatprep.mubr.bf16.mxu1 %v2614_v49 }
 0x12f   :  { %735 = vmatpush1.bf16.msra.mxu0 %v1854_v12  ;;  %776 = vmatpush1.bf16.msra.mxu1 %v1859_v13 }
 0x130   :  { %736 = vmatprep.subr.bf16.mxu0 %v1871_v15  ;;  %777 = vmatprep.subr.bf16.mxu1 %v1877_v16 }
 0x133   :  { %737 = vmatpush1.bf16.msra.mxu0 %v1883_v17  ;;  %778 = vmatpush1.bf16.msra.mxu1 %v1888_v18 }
 0x134   :  { %738 = vmatprep.subr.bf16.mxu0 %v1895_v19  ;;  %779 = vmatprep.subr.bf16.mxu1 %v1901_v20 }
 0x137   :  { %739 = vmatpush1.bf16.msra.mxu0 %v1908_v21  ;;  %780 = vmatpush1.bf16.msra.mxu1 %v1914_v22 }
 0x138   :  { %740 = vmatprep.subr.bf16.mxu0 %v1922_v23  ;;  %781 = vmatprep.subr.bf16.mxu1 %v1929_v24 }
 0x13b   :  { %741 = vmatpush1.bf16.msra.mxu0 %v1938_v26  ;;  %782 = vmatpush1.bf16.msra.mxu1 %v1945_v27 }
 0x13c   :  { %742 = vmatprep.subr.bf16.mxu0 %v1950_v28  ;;  %783 = vmatprep.subr.bf16.mxu1 %v1956_v29 }
 0x13f   :  { %743 = vmatpush1.bf16.msra.mxu0 %v1964_v30  ;;  %784 = vmatpush1.bf16.msra.mxu1 %v1969_v31 }
 0x140   :  { %744 = vmatprep.subr.bf16.mxu0 %v1977_v32  ;;  %785 = vmatprep.subr.bf16.mxu1 %v1984_v33 }
 0x143   :  { %745 = vmatpush1.bf16.msra.mxu0 %v1993_v35  ;;  %786 = vmatpush1.bf16.msra.mxu1 %v2000_v36 }
 0x144   :  { %746 = vmatprep.subr.bf16.mxu0 %v2005_v37  ;;  %787 = vmatprep.subr.bf16.mxu1 %v2011_v38 }
 0x147   :  { %747 = vmatpush1.bf16.msra.mxu0 %v2019_v39  ;;  %788 = vmatpush1.bf16.msra.mxu1 %v2030_v41 }
 0x148   :  { %852 = vmatprep.subr.bf16.mxu0 %v1819_v6  ;;  %893 = vmatprep.subr.bf16.mxu1 %v1824_v7 }
 0x1fd   :  { %v646_v42 = vpop.f32.mrb[20].mxu0  ;;  %v687_v44 = vpop.f32.mrb[20].mxu1 }
 0x1fe   :  { %v694_v48 = vadd.f32 %v646_v42, %v2083_v60  ;;  %v696_v59 = vadd.f32 %v687_v44, %v2086_v62  ;;  %v648_v4 = vpop.f32.mrb[21].mxu0  ;;  %v689_v51 = vpop.f32.mrb[21].mxu1 }
 0x1ff   :  { %v695_v54 = vadd.f32 %v648_v4, %v2088_v0  ;;  %v697_v50 = vadd.f32 %v689_v51, %v2091_v2  ;;  %v650_v52 = vpop.f32.mrb[22].mxu0  ;;  %v691_v55 = vpop.f32.mrb[22].mxu1 }
 0x200   :  { %v1511_v53 = vmul.f32 -1.442695, %v694_v48  ;;  %v651_v1 = vpop.f32.mrb[23].mxu0  ;;  %v692_v56 = vpop.f32.mrb[23].mxu1 }
 0x201   :  { %v1512_v57 = vmul.f32 -1.442695, %v695_v54  ;;  %v1513_v47 = vmul.f32 -1.442695, %v697_v50 }
 0x202   :  { %1614 = vpow2.f32 %v1511_v53  ;;  %v2615_v53 = vld [vmem:[#allocation3_spill] sm:$0xff] }
 0x203   :  { %1616 = vpow2.f32 %v1512_v57 }
 0x204   :  { %1618 = vpow2.f32 %v1513_v47 }
 0x205   :  { %1620 = vtanh.f32 %v696_v59 }
 0x20c   :  { %v1615_v58 = vpop.eup %1614 }
 0x20d   :  { %v1617_v63 = vpop.eup %1616  ;;  %v701_v60 = vadd.f32 1.0, %v1615_v58 }
 0x20e   :  { %v707_v62 = vadd.f32 1.0, %v1617_v63  ;;  %v1619_v0 = vpop.eup %1618 }
 0x20f   :  { %1622 = vrcp.f32 %v701_v60  ;;  %v1621_v34 = vpop.eup %1620  ;;  %v714_v14 = vadd.f32 1.0, %v1619_v0 }
 0x210   :  { %1624 = vrcp.f32 %v707_v62 }
 0x211   :  { %1626 = vrcp.f32 %v714_v14 }
 0x219   :  { %v1623_v2 = vpop.eup %1622 }
 0x21a   :  { %v1625_v43 = vpop.eup %1624  ;;  %v718_v61 = vmul.f32 %v1623_v2, %v1621_v34 }
 0x21b   :  { %v717_v46 = vmul.f32 %v1625_v43, %v2160_v45  ;;  %v1627_v42 = vpop.eup %1626 }
 0x21d   :  { %v2205_v3 = vadd.f32 %v718_v61, %v717_v46 }
 0x21f   :  { %1628 = vtanh.f32 %v2205_v3 }
 0x229   :  { %v1629_v44 = vpop.eup %1628 }
 0x22a   :  { %v721_v48 = vmul.f32 %v1629_v44, %v1627_v42 }
 0x22c   :  { %1514 = vst [vmem:[%s2589_s6 + $0x8] sm:$0xff] %v721_v48  ;;  %v731_v59 = vpack.c.bf16 %v721_v48, %v721_v48 }
 0x22e   :  { %765 = vmatmul.mubr.bf16.vlgmr.msra.gmra.mrb[24].mxu0 %v731_v59  ;;  %806 = vmatmul.mubr.bf16.vlgmr.msra.gmra.mrb[24].mxu1 %v731_v59 }
 0x22f   :  { %853 = vmatpush1.bf16.msra.mxu0 %v1829_v8  ;;  %894 = vmatpush1.bf16.msra.mxu1 %v1835_v9 }
 0x230   :  { %854 = vmatprep.subr.bf16.mxu0 %v1842_v10  ;;  %895 = vmatprep.subr.bf16.mxu1 %v1849_v11 }
 0x231   :  { %884 = vmatprep.mubr.bf16.mxu0 %v2614_v49  ;;  %925 = vmatprep.mubr.bf16.mxu1 %v2614_v49 }
 0x233   :  { %855 = vmatpush1.bf16.msra.mxu0 %v1854_v12  ;;  %896 = vmatpush1.bf16.msra.mxu1 %v1859_v13 }
 0x234   :  { %856 = vmatprep.subr.bf16.mxu0 %v1871_v15  ;;  %897 = vmatprep.subr.bf16.mxu1 %v1877_v16 }
 0x237   :  { %857 = vmatpush1.bf16.msra.mxu0 %v1883_v17  ;;  %898 = vmatpush1.bf16.msra.mxu1 %v1888_v18 }
 0x238   :  { %858 = vmatprep.subr.bf16.mxu0 %v1895_v19  ;;  %899 = vmatprep.subr.bf16.mxu1 %v1901_v20 }
 0x23b   :  { %859 = vmatpush1.bf16.msra.mxu0 %v1908_v21  ;;  %900 = vmatpush1.bf16.msra.mxu1 %v1914_v22 }
 0x23c   :  { %860 = vmatprep.subr.bf16.mxu0 %v1922_v23  ;;  %901 = vmatprep.subr.bf16.mxu1 %v1929_v24 }
 0x23f   :  { %861 = vmatpush1.bf16.msra.mxu0 %v1938_v26  ;;  %902 = vmatpush1.bf16.msra.mxu1 %v1945_v27 }
 0x240   :  { %862 = vmatprep.subr.bf16.mxu0 %v1950_v28  ;;  %903 = vmatprep.subr.bf16.mxu1 %v1956_v29 }
 0x243   :  { %863 = vmatpush1.bf16.msra.mxu0 %v1964_v30  ;;  %904 = vmatpush1.bf16.msra.mxu1 %v1969_v31 }
 0x244   :  { %864 = vmatprep.subr.bf16.mxu0 %v1977_v32  ;;  %905 = vmatprep.subr.bf16.mxu1 %v1984_v33 }
 0x247   :  { %865 = vmatpush1.bf16.msra.mxu0 %v1993_v35  ;;  %906 = vmatpush1.bf16.msra.mxu1 %v2000_v36 }
 0x248   :  { %866 = vmatprep.subr.bf16.mxu0 %v2005_v37  ;;  %907 = vmatprep.subr.bf16.mxu1 %v2011_v38 }
 0x24b   :  { %867 = vmatpush1.bf16.msra.mxu0 %v2019_v39  ;;  %908 = vmatpush1.bf16.msra.mxu1 %v2030_v41 }
 0x24c   :  { %972 = vmatprep.subr.bf16.mxu0 %v1819_v6  ;;  %1013 = vmatprep.subr.bf16.mxu1 %v1824_v7 }
 0x301   :  { %v766_v45 = vpop.f32.mrb[24].mxu0  ;;  %v807_v4 = vpop.f32.mrb[24].mxu1 }
 0x302   :  { %v814_v51 = vadd.f32 %v766_v45, %v2093_v5  ;;  %v816_v54 = vadd.f32 %v807_v4, %v2096_v25  ;;  %v768_v50 = vpop.f32.mrb[25].mxu0  ;;  %v809_v52 = vpop.f32.mrb[25].mxu1 }
 0x303   :  { %v815_v55 = vadd.f32 %v768_v50, %v2098_v40  ;;  %v817_v1 = vadd.f32 %v809_v52, %v2615_v53  ;;  %v770_v56 = vpop.f32.mrb[26].mxu0  ;;  %v811_v57 = vpop.f32.mrb[26].mxu1  ;;  %v2617_v52 = vld [vmem:[#allocation5_spill] sm:$0xff] }
 0x304   :  { %v1515_v47 = vmul.f32 -1.442695, %v814_v51  ;;  %v771_v58 = vpop.f32.mrb[27].mxu0  ;;  %v812_v63 = vpop.f32.mrb[27].mxu1  ;;  %v2618_v56 = vld [vmem:[#allocation6_spill] sm:$0xff] }
 0x305   :  { %v1516_v60 = vmul.f32 -1.442695, %v815_v55  ;;  %v1517_v62 = vmul.f32 -1.442695, %v817_v1 }
 0x306   :  { %1630 = vpow2.f32 %v1515_v47  ;;  %v2619_v47 = vld [vmem:[#allocation7_spill] sm:$0xff] }
 0x307   :  { %1632 = vpow2.f32 %v1516_v60 }
 0x308   :  { %1634 = vpow2.f32 %v1517_v62 }
 0x309   :  { %1636 = vtanh.f32 %v816_v54  ;;  %v2616_v54 = vld [vmem:[#allocation4_spill] sm:$0xff] }
 0x310   :  { %v1631_v0 = vpop.eup %1630 }
 0x311   :  { %v1633_v34 = vpop.eup %1632  ;;  %v821_v5 = vadd.f32 1.0, %v1631_v0 }
 0x312   :  { %v827_v25 = vadd.f32 1.0, %v1633_v34  ;;  %v1635_v40 = vpop.eup %1634 }
 0x313   :  { %1638 = vrcp.f32 %v821_v5  ;;  %v1637_v2 = vpop.eup %1636  ;;  %v834_v46 = vadd.f32 1.0, %v1635_v40 }
 0x314   :  { %1640 = vrcp.f32 %v827_v25 }
 0x315   :  { %1642 = vrcp.f32 %v834_v46 }
 0x31d   :  { %v1639_v43 = vpop.eup %1638 }
 0x31e   :  { %v1641_v61 = vpop.eup %1640  ;;  %v838_v14 = vmul.f32 %v1639_v43, %v1637_v2 }
 0x31f   :  { %v837_v42 = vmul.f32 %v1641_v61, %v2205_v3  ;;  %v1643_v48 = vpop.eup %1642 }
 0x321   :  { %v2250_v44 = vadd.f32 %v838_v14, %v837_v42 }
 0x323   :  { %1644 = vtanh.f32 %v2250_v44 }
 0x32d   :  { %v1645_v59 = vpop.eup %1644 }
 0x32e   :  { %v841_v45 = vmul.f32 %v1645_v59, %v1643_v48 }
 0x330   :  { %1518 = vst [vmem:[%s2589_s6 + $0x10] sm:$0xff] %v841_v45  ;;  %v851_v4 = vpack.c.bf16 %v841_v45, %v841_v45 }
 0x332   :  { %885 = vmatmul.mubr.bf16.vlgmr.msra.gmra.mrb[28].mxu0 %v851_v4  ;;  %926 = vmatmul.mubr.bf16.vlgmr.msra.gmra.mrb[28].mxu1 %v851_v4 }
 0x333   :  { %973 = vmatpush1.bf16.msra.mxu0 %v1829_v8  ;;  %1014 = vmatpush1.bf16.msra.mxu1 %v1835_v9 }
 0x334   :  { %974 = vmatprep.subr.bf16.mxu0 %v1842_v10  ;;  %1015 = vmatprep.subr.bf16.mxu1 %v1849_v11 }
 0x335   :  { %1004 = vmatprep.mubr.bf16.mxu0 %v2614_v49  ;;  %1045 = vmatprep.mubr.bf16.mxu1 %v2614_v49 }
 0x337   :  { %975 = vmatpush1.bf16.msra.mxu0 %v1854_v12  ;;  %1016 = vmatpush1.bf16.msra.mxu1 %v1859_v13 }
 0x338   :  { %976 = vmatprep.subr.bf16.mxu0 %v1871_v15  ;;  %1017 = vmatprep.subr.bf16.mxu1 %v1877_v16 }
 0x33b   :  { %977 = vmatpush1.bf16.msra.mxu0 %v1883_v17  ;;  %1018 = vmatpush1.bf16.msra.mxu1 %v1888_v18 }
 0x33c   :  { %978 = vmatprep.subr.bf16.mxu0 %v1895_v19  ;;  %1019 = vmatprep.subr.bf16.mxu1 %v1901_v20 }
 0x33f   :  { %979 = vmatpush1.bf16.msra.mxu0 %v1908_v21  ;;  %1020 = vmatpush1.bf16.msra.mxu1 %v1914_v22 }
 0x340   :  { %980 = vmatprep.subr.bf16.mxu0 %v1922_v23  ;;  %1021 = vmatprep.subr.bf16.mxu1 %v1929_v24 }
 0x343   :  { %981 = vmatpush1.bf16.msra.mxu0 %v1938_v26  ;;  %1022 = vmatpush1.bf16.msra.mxu1 %v1945_v27 }
 0x344   :  { %982 = vmatprep.subr.bf16.mxu0 %v1950_v28  ;;  %1023 = vmatprep.subr.bf16.mxu1 %v1956_v29 }
 0x347   :  { %983 = vmatpush1.bf16.msra.mxu0 %v1964_v30  ;;  %1024 = vmatpush1.bf16.msra.mxu1 %v1969_v31 }
 0x348   :  { %984 = vmatprep.subr.bf16.mxu0 %v1977_v32  ;;  %1025 = vmatprep.subr.bf16.mxu1 %v1984_v33 }
 0x34b   :  { %985 = vmatpush1.bf16.msra.mxu0 %v1993_v35  ;;  %1026 = vmatpush1.bf16.msra.mxu1 %v2000_v36 }
 0x34c   :  { %986 = vmatprep.subr.bf16.mxu0 %v2005_v37  ;;  %1027 = vmatprep.subr.bf16.mxu1 %v2011_v38 }
 0x34f   :  { %987 = vmatpush1.bf16.msra.mxu0 %v2019_v39  ;;  %1028 = vmatpush1.bf16.msra.mxu1 %v2030_v41 }
 0x350   :  { %1092 = vmatprep.subr.bf16.mxu0 %v1819_v6  ;;  %1133 = vmatprep.subr.bf16.mxu1 %v1824_v7 }
 0x405   :  { %v886_v3 = vpop.f32.mrb[28].mxu0  ;;  %v927_v51 = vpop.f32.mrb[28].mxu1 }
 0x406   :  { %v934_v50 = vadd.f32 %v886_v3, %v2616_v54  ;;  %v936_v55 = vadd.f32 %v927_v51, %v2617_v52  ;;  %v888_v53 = vpop.f32.mrb[29].mxu0  ;;  %v929_v1 = vpop.f32.mrb[29].mxu1 }
 0x407   :  { %v935_v57 = vadd.f32 %v888_v53, %v2618_v56  ;;  %v937_v58 = vadd.f32 %v929_v1, %v2619_v47  ;;  %v890_v63 = vpop.f32.mrb[30].mxu0  ;;  %v931_v60 = vpop.f32.mrb[30].mxu1 }
 0x408   :  { %v1519_v62 = vmul.f32 -1.442695, %v934_v50  ;;  %v891_v0 = vpop.f32.mrb[31].mxu0  ;;  %v932_v34 = vpop.f32.mrb[31].mxu1 }
 0x409   :  { %v1520_v6 = vmul.f32 -1.442695, %v935_v57  ;;  %v1521_v7 = vmul.f32 -1.442695, %v937_v58  ;;  %v2359_v0 = vld [vmem:[%s2585_s2] ss:$16 sps:$4 sm:$0xff]  }
 0x40a   :  { %1646 = vpow2.f32 %v1519_v62  ;;  %v2365_v34 = vld [vmem:[%s2585_s2 + $0x8] ss:$16 sps:$4 sm:$0xff]  }
 0x40b   :  { %1648 = vpow2.f32 %v1520_v6  ;;  %v2371_v6 = vld [vmem:[%s2585_s2 + $0x24] ss:$16 sps:$4 sm:$0xff]  }
 0x40c   :  { %1650 = vpow2.f32 %v1521_v7  ;;  %v2377_v7 = vld [vmem:[%s2585_s2 + $0x2c] ss:$16 sps:$4 sm:$0xff]  }
 0x40d   :  { %1652 = vtanh.f32 %v936_v55 }
 0x414   :  { %v1647_v5 = vpop.eup %1646 }
 0x415   :  { %v1649_v25 = vpop.eup %1648  ;;  %v941_v40 = vadd.f32 1.0, %v1647_v5  ;;  %v2385_v5 = vld [vmem:[%s2585_s2 + $0x20] ss:$16 sps:$4 sm:$0xff]  }
 0x416   :  { %v947_v2 = vadd.f32 1.0, %v1649_v25  ;;  %v1651_v43 = vpop.eup %1650  ;;  %v2391_v25 = vld [vmem:[%s2585_s2 + $0x28] ss:$16 sps:$4 sm:$0xff]  }
 0x417   :  { %1654 = vrcp.f32 %v941_v40  ;;  %v1653_v61 = vpop.eup %1652  ;;  %v954_v48 = vadd.f32 1.0, %v1651_v43  ;;  %v2397_v40 = vld [vmem:[%s2585_s2 + $0x44] ss:$16 sps:$4 sm:$0xff]   ;;  %v2409_v43 = vld [vmem:[%s2585_s2 + $0x40] ss:$16 sps:$4 sm:$0xff]  }
 0x418   :  { %1656 = vrcp.f32 %v947_v2  ;;  %v2403_v2 = vld [vmem:[%s2585_s2 + $0x4c] ss:$16 sps:$4 sm:$0xff]  }
 0x419   :  { %1658 = vrcp.f32 %v954_v48  ;;  %v2439_v48 = vld [vmem:[%s2585_s2 + $0x68] ss:$16 sps:$4 sm:$0xff]  }
 0x421   :  { %v1655_v14 = vpop.eup %1654 }
 0x422   :  { %v1657_v46 = vpop.eup %1656  ;;  %v958_v42 = vmul.f32 %v1655_v14, %v1653_v61  ;;  %v2415_v61 = vld [vmem:[%s2585_s2 + $0x48] ss:$16 sps:$4 sm:$0xff]   ;;  %v2421_v14 = vld [vmem:[%s2585_s2 + $0x64] ss:$16 sps:$4 sm:$0xff]  }
 0x423   :  { %v957_v59 = vmul.f32 %v1657_v46, %v2250_v44  ;;  %v1659_v4 = vpop.eup %1658  ;;  %v2427_v46 = vld [vmem:[%s2585_s2 + $0x6c] ss:$16 sps:$4 sm:$0xff]  }
 0x425   :  { %v2295_v45 = vadd.f32 %v958_v42, %v957_v59  ;;  %v2433_v42 = vld [vmem:[%s2585_s2 + $0x60] ss:$16 sps:$4 sm:$0xff]   ;;  %v2445_v59 = vld [vmem:[%s2585_s2 + $0x84] ss:$16 sps:$4 sm:$0xff]  }
 0x427   :  { %1660 = vtanh.f32 %v2295_v45 }
 0x431   :  { %v1661_v3 = vpop.eup %1660 }
 0x432   :  { %v961_v51 = vmul.f32 %v1661_v3, %v1659_v4  ;;  %v2457_v4 = vld [vmem:[%s2585_s2 + $0x80] ss:$16 sps:$4 sm:$0xff]   ;;  %v2463_v3 = vld [vmem:[%s2585_s2 + $0x88] ss:$16 sps:$4 sm:$0xff]  }
 0x434   :  { %1522 = vst [vmem:[%s2589_s6 + $0x18] sm:$0xff] %v961_v51  ;;  %v971_v54 = vpack.c.bf16 %v961_v51, %v961_v51  ;;  %v2469_v51 = vld [vmem:[%s2585_s2 + $0xa4] ss:$16 sps:$4 sm:$0xff]  }
 0x436   :  { %1005 = vmatmul.mubr.bf16.vlgmr.msra.gmra.mrb[32].mxu0 %v971_v54  ;;  %1046 = vmatmul.mubr.bf16.vlgmr.msra.gmra.mrb[32].mxu1 %v971_v54  ;;  %v2475_v54 = vld [vmem:[%s2585_s2 + $0xac] ss:$16 sps:$4 sm:$0xff]  }
 0x437   :  { %1093 = vmatpush1.bf16.msra.mxu0 %v1829_v8  ;;  %1134 = vmatpush1.bf16.msra.mxu1 %v1835_v9  ;;  %v2336_v8 = vld [vmem:[%s2585_s2 + $0x4] ss:$16 sps:$4 sm:$0xff]   ;;  %v2342_v9 = vld [vmem:[%s2585_s2 + $0xc] ss:$16 sps:$4 sm:$0xff]  }
 0x438   :  { %1094 = vmatprep.subr.bf16.mxu0 %v1842_v10  ;;  %1135 = vmatprep.subr.bf16.mxu1 %v1849_v11 }
 0x439   :  { %1124 = vmatprep.mubr.bf16.mxu0 %v2614_v49  ;;  %1165 = vmatprep.mubr.bf16.mxu1 %v2614_v49 }
 0x43b   :  { %1095 = vmatpush1.bf16.msra.mxu0 %v1854_v12  ;;  %1136 = vmatpush1.bf16.msra.mxu1 %v1859_v13  ;;  %v2620_v12 = vld [vmem:[#allocation8_spill] sm:$0xff] }
 0x43c   :  { %1096 = vmatprep.subr.bf16.mxu0 %v1871_v15  ;;  %1137 = vmatprep.subr.bf16.mxu1 %v1877_v16  ;;  %v2621_v15 = vld [vmem:[#allocation9_spill] sm:$0xff] }
 0x43f   :  { %1097 = vmatpush1.bf16.msra.mxu0 %v1883_v17  ;;  %1138 = vmatpush1.bf16.msra.mxu1 %v1888_v18 }
 0x440   :  { %1098 = vmatprep.subr.bf16.mxu0 %v1895_v19  ;;  %1139 = vmatprep.subr.bf16.mxu1 %v1901_v20  ;;  %v2622_v19 = vld [vmem:[#allocation10_spill] sm:$0xff] }
 0x443   :  { %1099 = vmatpush1.bf16.msra.mxu0 %v1908_v21  ;;  %1140 = vmatpush1.bf16.msra.mxu1 %v1914_v22  ;;  %v2623_v21 = vld [vmem:[#allocation11_spill] sm:$0xff] }
 0x444   :  { %1100 = vmatprep.subr.bf16.mxu0 %v1922_v23  ;;  %1141 = vmatprep.subr.bf16.mxu1 %v1929_v24 }
 0x447   :  { %1101 = vmatpush1.bf16.msra.mxu0 %v1938_v26  ;;  %1142 = vmatpush1.bf16.msra.mxu1 %v1945_v27 }
 0x448   :  { %1102 = vmatprep.subr.bf16.mxu0 %v1950_v28  ;;  %1143 = vmatprep.subr.bf16.mxu1 %v1956_v29 }
 0x44b   :  { %1103 = vmatpush1.bf16.msra.mxu0 %v1964_v30  ;;  %1144 = vmatpush1.bf16.msra.mxu1 %v1969_v31 }
 0x44c   :  { %1104 = vmatprep.subr.bf16.mxu0 %v1977_v32  ;;  %1145 = vmatprep.subr.bf16.mxu1 %v1984_v33 }
 0x44f   :  { %1105 = vmatpush1.bf16.msra.mxu0 %v1993_v35  ;;  %1146 = vmatpush1.bf16.msra.mxu1 %v2000_v36 }
 0x450   :  { %1106 = vmatprep.subr.bf16.mxu0 %v2005_v37  ;;  %1147 = vmatprep.subr.bf16.mxu1 %v2011_v38 }
 0x453   :  { %1107 = vmatpush1.bf16.msra.mxu0 %v2019_v39  ;;  %1148 = vmatpush1.bf16.msra.mxu1 %v2030_v41 }
 0x454   :  { %1212 = vmatprep.subr.bf16.mxu0 %v2336_v8  ;;  %1253 = vmatprep.subr.bf16.mxu1 %v2342_v9 }
 0x509   :  { %v1006_v10 = vpop.f32.mrb[32].mxu0  ;;  %v1047_v11 = vpop.f32.mrb[32].mxu1 }
 0x50a   :  { %v1054_v13 = vadd.f32 %v1006_v10, %v2620_v12  ;;  %v1056_v16 = vadd.f32 %v1047_v11, %v2621_v15  ;;  %v1008_v17 = vpop.f32.mrb[33].mxu0  ;;  %v1049_v18 = vpop.f32.mrb[33].mxu1  ;;  %v2481_v10 = vld [vmem:[%s2585_s2 + $0xa0] ss:$16 sps:$4 sm:$0xff]   ;;  %v2487_v11 = vld [vmem:[%s2585_s2 + $0xa8] ss:$16 sps:$4 sm:$0xff]  }
 0x50b   :  { %v1055_v20 = vadd.f32 %v1008_v17, %v2622_v19  ;;  %v1057_v22 = vadd.f32 %v1049_v18, %v2623_v21  ;;  %v1010_v23 = vpop.f32.mrb[34].mxu0  ;;  %v1051_v24 = vpop.f32.mrb[34].mxu1  ;;  %v2493_v12 = vld [vmem:[%s2585_s2 + $0xc4] ss:$16 sps:$4 sm:$0xff]   ;;  %v2624_v17 = vld [vmem:[#allocation12_spill] sm:$0xff]  ;;  %v2626_v21 = vld [vmem:[#allocation14_spill] sm:$0xff] }
 0x50c   :  { %v1523_v26 = vmul.f32 -1.442695, %v1054_v13  ;;  %v1011_v27 = vpop.f32.mrb[35].mxu0  ;;  %v1052_v28 = vpop.f32.mrb[35].mxu1  ;;  %v2499_v13 = vld [vmem:[%s2585_s2 + $0xcc] ss:$16 sps:$4 sm:$0xff]  }
 0x50d   :  { %v1524_v29 = vmul.f32 -1.442695, %v1055_v20  ;;  %v1525_v30 = vmul.f32 -1.442695, %v1057_v22  ;;  %v2625_v19 = vld [vmem:[#allocation13_spill] sm:$0xff]  ;;  %v2627_v22 = vld [vmem:[#allocation15_spill] sm:$0xff] }
 0x50e   :  { %1662 = vpow2.f32 %v1523_v26 }
 0x50f   :  { %1664 = vpow2.f32 %v1524_v29 }
 0x510   :  { %1666 = vpow2.f32 %v1525_v30 }
 0x511   :  { %1668 = vtanh.f32 %v1056_v16 }
 0x518   :  { %v1663_v31 = vpop.eup %1662 }
 0x519   :  { %v1665_v32 = vpop.eup %1664  ;;  %v1061_v33 = vadd.f32 1.0, %v1663_v31 }
 0x51a   :  { %v1067_v44 = vadd.f32 1.0, %v1665_v32  ;;  %v1667_v50 = vpop.eup %1666 }
 0x51b   :  { %1670 = vrcp.f32 %v1061_v33  ;;  %v1669_v52 = vpop.eup %1668  ;;  %v1074_v56 = vadd.f32 1.0, %v1667_v50 }
 0x51c   :  { %1672 = vrcp.f32 %v1067_v44 }
 0x51d   :  { %1674 = vrcp.f32 %v1074_v56 }
 0x525   :  { %v1671_v55 = vpop.eup %1670 }
 0x526   :  { %v1673_v53 = vpop.eup %1672  ;;  %v1078_v1 = vmul.f32 %v1671_v55, %v1669_v52 }
 0x527   :  { %v1077_v57 = vmul.f32 %v1673_v53, %v2295_v45  ;;  %v1675_v58 = vpop.eup %1674  ;;  %v2451_v45 = vld [vmem:[%s2585_s2 + $0x8c] ss:$16 sps:$4 sm:$0xff]  }
 0x529   :  { %v2350_v47 = vadd.f32 %v1078_v1, %v1077_v57 }
 0x52b   :  { %1676 = vtanh.f32 %v2350_v47 }
 0x535   :  { %v1677_v63 = vpop.eup %1676 }
 0x536   :  { %v1081_v60 = vmul.f32 %v1677_v63, %v1675_v58  ;;  %v1754_v63 = vld [vmem:[%s2585_s2 + $0xe4] ss:$16 sps:$4 sm:$0xff]  }
 0x538   :  { %1526 = vst [vmem:[%s2589_s6 + $0x20] sm:$0xff] %v1081_v60  ;;  %v1091_v62 = vpack.c.bf16 %v1081_v60, %v1081_v60  ;;  %v1755_v60 = vld [vmem:[%s2585_s2 + $0xec] ss:$16 sps:$4 sm:$0xff]  }
 0x53a   :  { %1125 = vmatmul.mubr.bf16.vlgmr.msra.gmra.mrb[36].mxu0 %v1091_v62  ;;  %1166 = vmatmul.mubr.bf16.vlgmr.msra.gmra.mrb[36].mxu1 %v1091_v62  ;;  %v1756_v62 = vld [vmem:[%s2585_s2 + $0xe0] ss:$16 sps:$4 sm:$0xff]  }
 0x53b   :  { %1213 = vmatpush1.bf16.msra.mxu0 %v2359_v0  ;;  %1254 = vmatpush1.bf16.msra.mxu1 %v2365_v34 }
 0x53c   :  { %1214 = vmatprep.subr.bf16.mxu0 %v2371_v6  ;;  %1255 = vmatprep.subr.bf16.mxu1 %v2377_v7 }
 0x53d   :  { %1244 = vmatprep.mubr.bf16.mxu0 %v2614_v49  ;;  %1285 = vmatprep.mubr.bf16.mxu1 %v2614_v49 }
 0x53f   :  { %1215 = vmatpush1.bf16.msra.mxu0 %v2385_v5  ;;  %1256 = vmatpush1.bf16.msra.mxu1 %v2391_v25 }
 0x540   :  { %1216 = vmatprep.subr.bf16.mxu0 %v2397_v40  ;;  %1257 = vmatprep.subr.bf16.mxu1 %v2403_v2 }
 0x543   :  { %1217 = vmatpush1.bf16.msra.mxu0 %v2409_v43  ;;  %1258 = vmatpush1.bf16.msra.mxu1 %v2415_v61 }
 0x544   :  { %1218 = vmatprep.subr.bf16.mxu0 %v2421_v14  ;;  %1259 = vmatprep.subr.bf16.mxu1 %v2427_v46 }
 0x547   :  { %1219 = vmatpush1.bf16.msra.mxu0 %v2433_v42  ;;  %1260 = vmatpush1.bf16.msra.mxu1 %v2439_v48 }
 0x548   :  { %1220 = vmatprep.subr.bf16.mxu0 %v2445_v59  ;;  %1261 = vmatprep.subr.bf16.mxu1 %v2451_v45 }
 0x54b   :  { %1221 = vmatpush1.bf16.msra.mxu0 %v2457_v4  ;;  %1262 = vmatpush1.bf16.msra.mxu1 %v2463_v3 }
 0x54c   :  { %1222 = vmatprep.subr.bf16.mxu0 %v2469_v51  ;;  %1263 = vmatprep.subr.bf16.mxu1 %v2475_v54 }
 0x54f   :  { %1223 = vmatpush1.bf16.msra.mxu0 %v2481_v10  ;;  %1264 = vmatpush1.bf16.msra.mxu1 %v2487_v11 }
 0x550   :  { %1224 = vmatprep.subr.bf16.mxu0 %v2493_v12  ;;  %1265 = vmatprep.subr.bf16.mxu1 %v2499_v13 }
 0x553   :  { %1225 = vmatpush1.bf16.msra.mxu0 %v1993_v35  ;;  %1266 = vmatpush1.bf16.msra.mxu1 %v2000_v36 }
 0x554   :  { %1226 = vmatprep.subr.bf16.mxu0 %v2005_v37  ;;  %1267 = vmatprep.subr.bf16.mxu1 %v2011_v38 }
 0x557   :  { %1227 = vmatpush1.bf16.msra.mxu0 %v2019_v39  ;;  %1268 = vmatpush1.bf16.msra.mxu1 %v2030_v41 }
 0x558   :  { %1332 = vmatprep.subr.bf16.mxu0 %v2336_v8  ;;  %1373 = vmatprep.subr.bf16.mxu1 %v2342_v9 }
 0x60d   :  { %v1126_v15 = vpop.f32.mrb[36].mxu0  ;;  %v1167_v16 = vpop.f32.mrb[36].mxu1 }
 0x60e   :  { %v1174_v18 = vadd.f32 %v1126_v15, %v2624_v17  ;;  %v1176_v35 = vadd.f32 %v1167_v16, %v2625_v19  ;;  %v1128_v20 = vpop.f32.mrb[37].mxu0  ;;  %v1169_v36 = vpop.f32.mrb[37].mxu1 }
 0x60f   :  { %v1175_v37 = vadd.f32 %v1128_v20, %v2626_v21  ;;  %v1177_v38 = vadd.f32 %v1169_v36, %v2627_v22  ;;  %v1130_v23 = vpop.f32.mrb[38].mxu0  ;;  %v1171_v39 = vpop.f32.mrb[38].mxu1 }
 0x610   :  { %v1527_v24 = vmul.f32 -1.442695, %v1174_v18  ;;  %v1131_v41 = vpop.f32.mrb[39].mxu0  ;;  %v1172_v26 = vpop.f32.mrb[39].mxu1 }
 0x611   :  { %v1528_v8 = vmul.f32 -1.442695, %v1175_v37  ;;  %v1529_v9 = vmul.f32 -1.442695, %v1177_v38  ;;  %v2633_v26 = vld [vmem:[#allocation21_spill] sm:$0xff] }
 0x612   :  { %1678 = vpow2.f32 %v1527_v24  ;;  %v2632_v24 = vld [vmem:[#allocation20_spill] sm:$0xff] }
 0x613   :  { %1680 = vpow2.f32 %v1528_v8 }
 0x614   :  { %1682 = vpow2.f32 %v1529_v9 }
 0x615   :  { %1684 = vtanh.f32 %v1176_v35 }
 0x61c   :  { %v1679_v27 = vpop.eup %1678 }
 0x61d   :  { %v1681_v28 = vpop.eup %1680  ;;  %v1181_v29 = vadd.f32 1.0, %v1679_v27 }
 0x61e   :  { %v1187_v30 = vadd.f32 1.0, %v1681_v28  ;;  %v1683_v31 = vpop.eup %1682  ;;  %v2634_v28 = vld [vmem:[#allocation22_spill] sm:$0xff] }
 0x61f   :  { %1686 = vrcp.f32 %v1181_v29  ;;  %v1685_v32 = vpop.eup %1684  ;;  %v1194_v52 = vadd.f32 1.0, %v1683_v31 }
 0x620   :  { %1688 = vrcp.f32 %v1187_v30  ;;  %v2635_v30 = vld [vmem:[#allocation23_spill] sm:$0xff] }
 0x621   :  { %1690 = vrcp.f32 %v1194_v52 }
 0x629   :  { %v1687_v33 = vpop.eup %1686 }
 0x62a   :  { %v1689_v44 = vpop.eup %1688  ;;  %v1198_v50 = vmul.f32 %v1687_v33, %v1685_v32 }
 0x62b   :  { %v1197_v55 = vmul.f32 %v1689_v44, %v2350_v47  ;;  %v1691_v1 = vpop.eup %1690  ;;  %v1753_v47 = vld [vmem:[%s2585_s2 + $0xc8] ss:$16 sps:$4 sm:$0xff]  }
 0x62d   :  { %v2515_v53 = vadd.f32 %v1198_v50, %v1197_v55 }
 0x62f   :  { %1692 = vtanh.f32 %v2515_v53 }
 0x639   :  { %v1693_v56 = vpop.eup %1692 }
 0x63a   :  { %v1201_v57 = vmul.f32 %v1693_v56, %v1691_v1 }
 0x63c   :  { %1530 = vst [vmem:[%s2589_s6 + $0x28] sm:$0xff] %v1201_v57  ;;  %v1211_v58 = vpack.c.bf16 %v1201_v57, %v1201_v57 }
 0x63e   :  { %1245 = vmatmul.mubr.bf16.vlgmr.msra.gmra.mrb[40].mxu0 %v1211_v58  ;;  %1286 = vmatmul.mubr.bf16.vlgmr.msra.gmra.mrb[40].mxu1 %v1211_v58 }
 0x63f   :  { %1333 = vmatpush1.bf16.msra.mxu0 %v2359_v0  ;;  %1374 = vmatpush1.bf16.msra.mxu1 %v2365_v34  ;;  %v1757_v0 = vld [vmem:[%s2585_s2 + $0xe8] ss:$16 sps:$4 sm:$0xff]  }
 0x640   :  { %1334 = vmatprep.subr.bf16.mxu0 %v2371_v6  ;;  %1375 = vmatprep.subr.bf16.mxu1 %v2377_v7  ;;  %v2628_v7 = vld [vmem:[#allocation16_spill] sm:$0xff] }
 0x641   :  { %1364 = vmatprep.mubr.bf16.mxu0 %v2614_v49  ;;  %1405 = vmatprep.mubr.bf16.mxu1 %v2614_v49  ;;  %v1752_v49 = vld [vmem:[%s2585_s2 + $0xc0] ss:$16 sps:$4 sm:$0xff]  }
 0x643   :  { %1335 = vmatpush1.bf16.msra.mxu0 %v2385_v5  ;;  %1376 = vmatpush1.bf16.msra.mxu1 %v2391_v25  ;;  %v2629_v25 = vld [vmem:[#allocation17_spill] sm:$0xff] }
 0x644   :  { %1336 = vmatprep.subr.bf16.mxu0 %v2397_v40  ;;  %1377 = vmatprep.subr.bf16.mxu1 %v2403_v2 }
 0x647   :  { %1337 = vmatpush1.bf16.msra.mxu0 %v2409_v43  ;;  %1378 = vmatpush1.bf16.msra.mxu1 %v2415_v61  ;;  %v2630_v61 = vld [vmem:[#allocation18_spill] sm:$0xff] }
 0x648   :  { %1338 = vmatprep.subr.bf16.mxu0 %v2421_v14  ;;  %1379 = vmatprep.subr.bf16.mxu1 %v2427_v46  ;;  %v2631_v46 = vld [vmem:[#allocation19_spill] sm:$0xff] }
 0x64b   :  { %1339 = vmatpush1.bf16.msra.mxu0 %v2433_v42  ;;  %1380 = vmatpush1.bf16.msra.mxu1 %v2439_v48 }
 0x64c   :  { %1340 = vmatprep.subr.bf16.mxu0 %v2445_v59  ;;  %1381 = vmatprep.subr.bf16.mxu1 %v2451_v45 }
 0x64f   :  { %1341 = vmatpush1.bf16.msra.mxu0 %v2457_v4  ;;  %1382 = vmatpush1.bf16.msra.mxu1 %v2463_v3 }
 0x650   :  { %1342 = vmatprep.subr.bf16.mxu0 %v2469_v51  ;;  %1383 = vmatprep.subr.bf16.mxu1 %v2475_v54 }
 0x653   :  { %1343 = vmatpush1.bf16.msra.mxu0 %v2481_v10  ;;  %1384 = vmatpush1.bf16.msra.mxu1 %v2487_v11 }
 0x654   :  { %1344 = vmatprep.subr.bf16.mxu0 %v2493_v12  ;;  %1385 = vmatprep.subr.bf16.mxu1 %v2499_v13 }
 0x657   :  { %1345 = vmatpush1.bf16.msra.mxu0 %v1752_v49  ;;  %1386 = vmatpush1.bf16.msra.mxu1 %v1753_v47 }
 0x658   :  { %1346 = vmatprep.subr.bf16.mxu0 %v1754_v63  ;;  %1387 = vmatprep.subr.bf16.mxu1 %v1755_v60 }
 0x65b   :  { %1347 = vmatpush1.bf16.msra.mxu0 %v1756_v62  ;;  %1388 = vmatpush1.bf16.msra.mxu1 %v1757_v0 }
 0x711   :  { %v1246_v34 = vpop.f32.mrb[40].mxu0  ;;  %v1287_v6 = vpop.f32.mrb[40].mxu1 }
 0x712   :  { %v1294_v5 = vadd.f32 %v1246_v34, %v2628_v7  ;;  %v1296_v40 = vadd.f32 %v1287_v6, %v2629_v25  ;;  %v1248_v2 = vpop.f32.mrb[41].mxu0  ;;  %v1289_v43 = vpop.f32.mrb[41].mxu1 }
 0x713   :  { %v1295_v14 = vadd.f32 %v1248_v2, %v2630_v61  ;;  %v1297_v42 = vadd.f32 %v1289_v43, %v2631_v46  ;;  %v1250_v48 = vpop.f32.mrb[42].mxu0  ;;  %v1291_v59 = vpop.f32.mrb[42].mxu1 }
 0x714   :  { %v1531_v45 = vmul.f32 -1.442695, %v1294_v5  ;;  %v1251_v4 = vpop.f32.mrb[43].mxu0  ;;  %v1292_v3 = vpop.f32.mrb[43].mxu1 }
 0x715   :  { %v1532_v51 = vmul.f32 -1.442695, %v1295_v14  ;;  %v1533_v54 = vmul.f32 -1.442695, %v1297_v42 }
 0x716   :  { %1694 = vpow2.f32 %v1531_v45 }
 0x717   :  { %1696 = vpow2.f32 %v1532_v51 }
 0x718   :  { %1698 = vpow2.f32 %v1533_v54 }
 0x719   :  { %1700 = vtanh.f32 %v1296_v40 }
 0x720   :  { %v1695_v10 = vpop.eup %1694 }
 0x721   :  { %v1697_v11 = vpop.eup %1696  ;;  %v1301_v12 = vadd.f32 1.0, %v1695_v10 }
 0x722   :  { %v1307_v13 = vadd.f32 1.0, %v1697_v11  ;;  %v1699_v15 = vpop.eup %1698 }
 0x723   :  { %1702 = vrcp.f32 %v1301_v12  ;;  %v1701_v16 = vpop.eup %1700  ;;  %v1314_v35 = vadd.f32 1.0, %v1699_v15 }
 0x724   :  { %1704 = vrcp.f32 %v1307_v13 }
 0x725   :  { %1706 = vrcp.f32 %v1314_v35 }
 0x72d   :  { %v1703_v17 = vpop.eup %1702 }
 0x72e   :  { %v1705_v18 = vpop.eup %1704  ;;  %v1318_v19 = vmul.f32 %v1703_v17, %v1701_v16 }
 0x72f   :  { %v1317_v20 = vmul.f32 %v1705_v18, %v2515_v53  ;;  %v1707_v21 = vpop.eup %1706 }
 0x731   :  { %v1319_v36 = vadd.f32 %v1318_v19, %v1317_v20 }
 0x733   :  { %1708 = vtanh.f32 %v1319_v36 }
 0x73d   :  { %v1709_v37 = vpop.eup %1708 }
 0x73e   :  { %v1321_v22 = vmul.f32 %v1709_v37, %v1707_v21 }
 0x740   :  { %1534 = vst [vmem:[%s2589_s6 + $0x30] sm:$0xff] %v1321_v22  ;;  %v1331_v38 = vpack.c.bf16 %v1321_v22, %v1321_v22 }
 0x742   :  { %1365 = vmatmul.mubr.bf16.vlgmr.msra.gmra.mrb[44].mxu0 %v1331_v38  ;;  %1406 = vmatmul.mubr.bf16.vlgmr.msra.gmra.mrb[44].mxu1 %v1331_v38 }
 0x815   :  { %v1366_v23 = vpop.f32.mrb[44].mxu0  ;;  %v1407_v39 = vpop.f32.mrb[44].mxu1 }
 0x816   :  { %v1414_v41 = vadd.f32 %v1366_v23, %v2632_v24  ;;  %v1416_v8 = vadd.f32 %v1407_v39, %v2633_v26  ;;  %v1368_v9 = vpop.f32.mrb[45].mxu0  ;;  %v1409_v27 = vpop.f32.mrb[45].mxu1 }
 0x817   :  { %v1415_v29 = vadd.f32 %v1368_v9, %v2634_v28  ;;  %v1417_v31 = vadd.f32 %v1409_v27, %v2635_v30  ;;  %v1370_v32 = vpop.f32.mrb[46].mxu0  ;;  %v1411_v33 = vpop.f32.mrb[46].mxu1 }
 0x818   :  { %v1535_v44 = vmul.f32 -1.442695, %v1414_v41  ;;  %v1371_v50 = vpop.f32.mrb[47].mxu0  ;;  %v1412_v52 = vpop.f32.mrb[47].mxu1 }
 0x819   :  { %v1536_v55 = vmul.f32 -1.442695, %v1415_v29  ;;  %v1537_v53 = vmul.f32 -1.442695, %v1417_v31 }
 0x81a   :  { %1710 = vpow2.f32 %v1535_v44 }
 0x81b   :  { %1712 = vpow2.f32 %v1536_v55 }
 0x81c   :  { %1714 = vpow2.f32 %v1537_v53 }
 0x81d   :  { %1716 = vtanh.f32 %v1416_v8 }
 0x824   :  { %v1711_v1 = vpop.eup %1710 }
 0x825   :  { %v1713_v56 = vpop.eup %1712  ;;  %v1421_v57 = vadd.f32 1.0, %v1711_v1 }
 0x826   :  { %v1427_v58 = vadd.f32 1.0, %v1713_v56  ;;  %v1715_v49 = vpop.eup %1714 }
 0x827   :  { %1718 = vrcp.f32 %v1421_v57  ;;  %v1717_v47 = vpop.eup %1716  ;;  %v1434_v0 = vadd.f32 1.0, %v1715_v49 }
 0x828   :  { %1720 = vrcp.f32 %v1427_v58 }
 0x829   :  { %1722 = vrcp.f32 %v1434_v0 }
 0x831   :  { %v1719_v63 = vpop.eup %1718 }
 0x832   :  { %v1721_v60 = vpop.eup %1720  ;;  %v1438_v62 = vmul.f32 %v1719_v63, %v1717_v47 }
 0x833   :  { %v1437_v34 = vmul.f32 %v1721_v60, %v1319_v36  ;;  %v1723_v7 = vpop.eup %1722 }
 0x835   :  { %v1439_v6 = vadd.f32 %v1438_v62, %v1437_v34 }
 0x837   :  { %1724 = vtanh.f32 %v1439_v6  ;;  %1444 = vst [vmem:[%s2590_s7] sm:$0xff] %v1439_v6 }
 0x841   :  { %v1725_v5 = vpop.eup %1724 }
 0x842   :  { %v1441_v25 = vmul.f32 %v1725_v5, %v1723_v7 }
 0x844   :  { %1538 = vst [vmem:[%s2589_s6 + $0x38] sm:$0xff] %v1441_v25 }

</bundles_post_ra>
